<compile_context>
chip_gen: v6e
topology: v6e:2x2x1
jax: 0.10.0
libtpu: 0.0.40
codegen_flags: <defaults>
</compile_context>

<pallas_src>
import jax
import jax.numpy as jnp
from jax.experimental import pallas as pl
from jax.experimental.pallas import tpu as pltpu

# logical layer widths (PyTorch module) and padded widths used by the kernel
DIMS = [784, 512, 256, 128, 64, 10]
NUM_CLASSES = 10
PAD_HIDDEN = 128          # fc4 out / fc5 in padded 64 -> 128
PAD_OUT = 128             # logits padded 10 -> 128 (lane-dense output)
BIAS_PACK_WIDTH = 512     # all biases zero-padded to 512 lanes
KERNEL_WIDTHS = [512, 256, 128, PAD_HIDDEN, PAD_OUT]


def _round_up(x, m):
    return (x + m - 1) // m * m


def mlp_kernel(x_ref, w1_ref, w2_ref, w3_ref, w4_ref, w5_ref, b_ref, out_ref):
    """Fused 5-layer MLP + log_softmax for one (TILE_M, 784) batch tile.

    x_ref           : (TILE_M, 784) f32   (cast to bf16 in-kernel)
    w{1..5}_ref     : bf16 weights, (in, out); fc4/fc5 padded to 128 hidden,
                      fc5 output padded to 128 classes (zero columns)
    b_ref           : (5, 512) f32, row l = bias of layer l zero-padded
    out_ref         : (TILE_M, 128) f32; columns 0..9 are the log-probs
    """
    # in-kernel f32 -> bf16 cast (VPU work hidden under the MXU chain)
    h = x_ref[...].astype(jnp.bfloat16)

    def layer(h_bf16, w_ref, row, width, relu):
        bias = b_ref[row:row + 1, 0:width]                       # (1, width) f32
        y = jnp.dot(h_bf16, w_ref[...],
                    preferred_element_type=jnp.float32) + bias   # f32 accumulate
        if relu:
            y = jnp.maximum(y, 0.0)
            return y.astype(jnp.bfloat16)                        # bf16 for next MXU op
        return y                                                 # keep logits in f32

    h = layer(h, w1_ref, 0, KERNEL_WIDTHS[0], relu=True)
    h = layer(h, w2_ref, 1, KERNEL_WIDTHS[1], relu=True)
    h = layer(h, w3_ref, 2, KERNEL_WIDTHS[2], relu=True)
    h = layer(h, w4_ref, 3, KERNEL_WIDTHS[3], relu=True)         # padded 128-wide hidden
    logits = layer(h, w5_ref, 4, KERNEL_WIDTHS[4], relu=False)   # (TILE_M, 128) f32

    # mask the 118 padded class lanes so they don't corrupt max / logsumexp
    lane = jax.lax.broadcasted_iota(jnp.int32, logits.shape, dimension=1)
    masked = jnp.where(lane < NUM_CLASSES, logits, jnp.float32(-1e30))

    # numerically stable log_softmax over the (masked) class axis
    m = jnp.max(masked, axis=-1, keepdims=True)
    shifted = masked - m
    lse = jnp.log(jnp.sum(jnp.exp(shifted), axis=-1, keepdims=True))
    out_ref[...] = (shifted - lse).astype(out_ref.dtype)


def init_params(key):
    """Deterministic init mimicking nn.Linear's U(-1/sqrt(fan_in), 1/sqrt(fan_in)).

    Returns logical (unpadded, f32) parameters stored as (in, out) weights.
    """
    params = []
    for i in range(5):
        fan_in, fan_out = DIMS[i], DIMS[i + 1]
        key, kw, kb = jax.random.split(key, 3)
        bound = 1.0 / jnp.sqrt(fan_in)
        w = jax.random.uniform(kw, (fan_in, fan_out), jnp.float32, -bound, bound)
        b = jax.random.uniform(kb, (1, fan_out), jnp.float32, -bound, bound)
        params.append((w, b))
    return params


def prepare_params(params):
    """Cast weights to bf16, zero-pad the 64-wide hidden layer to 128, pad the
    10 output classes to 128 columns, and pack all biases into one (5, 512)
    f32 array.  All padding is exact (zero rows/cols contribute nothing)."""
    (w1, b1), (w2, b2), (w3, b3), (w4, b4), (w5, b5) = params

    # fc4 output 64 -> 128, fc5 input 64 -> 128, fc5 output 10 -> 128
    w4p = jnp.pad(w4, ((0, 0), (0, PAD_HIDDEN - w4.shape[1])))
    w5p = jnp.pad(w5, ((0, PAD_HIDDEN - w5.shape[0]), (0, PAD_OUT - w5.shape[1])))

    weights_bf16 = [w.astype(jnp.bfloat16) for w in (w1, w2, w3, w4p, w5p)]

    rows = []
    for b in (b1, b2, b3, b4, b5):
        b = b.reshape(-1)
        rows.append(jnp.pad(b, (0, BIAS_PACK_WIDTH - b.shape[0])))
    bias_pack = jnp.stack(rows, axis=0).astype(jnp.float32)      # (5, 512)
    return weights_bf16, bias_pack


def my_awesome_model(x_nchw, weights_bf16, bias_pack, *, tile_m=512):
    """Forward pass. x_nchw: [B, 1, 28, 28] f32. Returns [B, 10] f32 log-probs."""
    B = x_nchw.shape[0]
    x = x_nchw.reshape(B, -1).astype(jnp.float32)    # keep f32; cast in-kernel
    d_in = x.shape[1]

    # Batch tiling:
    #  * large batch: tile_m rows per step (default 512, a multiple of 256)
    #  * small batch: split into exactly TWO tiles so the "parallel" axis can
    #    feed both TensorCores (v7x) / both megacore halves.
    if B >= 2 * tile_m:
        tm = tile_m
        b_pad = _round_up(B, tm)
    else:
        tm = max(8, _round_up(pl.cdiv(B, 2), 8))     # f32 tiles need multiples of 8
        b_pad = 2 * tm
    if b_pad != B:
        x = jnp.pad(x, ((0, b_pad - B), (0, 0)))
    grid = (b_pad // tm,)

    in_specs = [pl.BlockSpec((tm, d_in), lambda i: (i, 0))]      # batch-tiled input
    for w in weights_bf16:                                       # VMEM-resident weights
        in_specs.append(pl.BlockSpec(w.shape, lambda i: (0, 0)))
    in_specs.append(pl.BlockSpec(bias_pack.shape, lambda i: (0, 0)))

    out = pl.pallas_call(
        mlp_kernel,
        out_shape=jax.ShapeDtypeStruct((b_pad, PAD_OUT), jnp.float32),
        grid=grid,
        in_specs=in_specs,
        out_specs=pl.BlockSpec((tm, PAD_OUT), lambda i: (i, 0)),  # lane-dense output
        compiler_params=pltpu.CompilerParams(
            dimension_semantics=("parallel",),     # shard batch tiles across cores
            vmem_limit_bytes=32 << 20,             # headroom for f32 input tiles
        ),
    )(x, *weights_bf16, bias_pack)
    return out[:B, :NUM_CLASSES]


def reference_f32(x_nchw, params):
    """Pure-f32 JAX reference (exact PyTorch semantics)."""
    B = x_nchw.shape[0]
    h = x_nchw.reshape(B, -1).astype(jnp.float32)
    for i, (w, b) in enumerate(params):
        h = h @ w + b
        if i < 4:
            h = jnp.maximum(h, 0.0)
    return jax.nn.log_softmax(h, axis=-1)


def reference_mixed(x_nchw, weights_bf16, bias_pack):
    """Reference mirroring the kernel's bf16-MXU / f32-accumulate precision."""
    B = x_nchw.shape[0]
    h = x_nchw.reshape(B, -1).astype(jnp.bfloat16)
    logits = None
    for i, (w, width) in enumerate(zip(weights_bf16, KERNEL_WIDTHS)):
        y = jnp.dot(h, w, preferred_element_type=jnp.float32) + bias_pack[i:i + 1, :width]
        if i < 4:
            h = jnp.maximum(y, 0.0).astype(jnp.bfloat16)
        else:
            logits = y[:, :NUM_CLASSES]
    return jax.nn.log_softmax(logits, axis=-1)


if __name__ == "__main__":
    key = jax.random.PRNGKey(0)
    key, kx = jax.random.split(key)

    # Small MNIST-shaped batch: [B, C, H, W] = [8, 1, 28, 28]
    x = jax.random.normal(kx, (8, 1, 28, 28), jnp.float32)
    params = init_params(key)
    weights_bf16, bias_pack = prepare_params(params)

    out = my_awesome_model(x, weights_bf16, bias_pack)
    out = jax.block_until_ready(out)
    assert out.shape == (8, 10), out.shape

    # tight check against a reference with identical mixed precision
    ref_mixed = reference_mixed(x, weights_bf16, bias_pack)
    tight_err = jnp.max(jnp.abs(out - ref_mixed))
    assert jnp.allclose(out, ref_mixed, atol=1e-3, rtol=1e-3), \
        f"mixed-precision max abs err = {tight_err}"

    # loose check against the exact f32 semantics (bf16 rounding budget)
    ref_f32 = reference_f32(x, params)
    loose_err = jnp.max(jnp.abs(out - ref_f32))
    assert jnp.allclose(out, ref_f32, atol=5e-2, rtol=5e-2), \
        f"f32-reference max abs err = {loose_err}"

    print("KERNEL_OK")
</pallas_src>

<mosaic_0001>
module attributes {stable_mosaic.version = 11 : i64} {
  func.func @mlp_kernel(%arg0: i32, %arg1: memref<8x784xf32, #tpu.memory_space<vmem>>, %arg2: memref<784x512xbf16, #tpu.memory_space<vmem>>, %arg3: memref<512x256xbf16, #tpu.memory_space<vmem>>, %arg4: memref<256x128xbf16, #tpu.memory_space<vmem>>, %arg5: memref<128x128xbf16, #tpu.memory_space<vmem>>, %arg6: memref<128x128xbf16, #tpu.memory_space<vmem>>, %arg7: memref<5x512xf32, #tpu.memory_space<vmem>>, %arg8: memref<8x128xf32, #tpu.memory_space<vmem>>) attributes {dimension_semantics = [#tpu.dimension_semantics<parallel>], iteration_bounds = array<i64: 2>, scalar_prefetch = 0 : i64, scratch_operands = 0 : i64, tpu.core_type = #tpu.core_type<tc>, window_params = [{transform_indices = @transform_0, window_bounds = array<i64: 8, 784>}, {pipeline_mode = #tpu.pipeline_mode<synchronous>, transform_indices = @transform_1, window_bounds = array<i64: 784, 512>}, {pipeline_mode = #tpu.pipeline_mode<synchronous>, transform_indices = @transform_2, window_bounds = array<i64: 512, 256>}, {pipeline_mode = #tpu.pipeline_mode<synchronous>, transform_indices = @transform_3, window_bounds = array<i64: 256, 128>}, {pipeline_mode = #tpu.pipeline_mode<synchronous>, transform_indices = @transform_4, window_bounds = array<i64: 128, 128>}, {pipeline_mode = #tpu.pipeline_mode<synchronous>, transform_indices = @transform_5, window_bounds = array<i64: 128, 128>}, {pipeline_mode = #tpu.pipeline_mode<synchronous>, transform_indices = @transform_6, window_bounds = array<i64: 5, 512>}, {transform_indices = @transform_7, window_bounds = array<i64: 8, 128>}]} {
    %c0 = arith.constant 0 : index
    %c0_0 = arith.constant 0 : index
    %0 = vector.load %arg1[%c0, %c0_0] : memref<8x784xf32, #tpu.memory_space<vmem>>, vector<8x784xf32>
    %1 = arith.truncf %0 : vector<8x784xf32> to vector<8x784xbf16>
    %c0_1 = arith.constant 0 : index
    %c0_2 = arith.constant 0 : index
    %2 = vector.load %arg7[%c0_1, %c0_2] : memref<5x512xf32, #tpu.memory_space<vmem>>, vector<1x512xf32>
    %c0_3 = arith.constant 0 : index
    %c0_4 = arith.constant 0 : index
    %3 = vector.load %arg2[%c0_3, %c0_4] : memref<784x512xbf16, #tpu.memory_space<vmem>>, vector<784x512xbf16>
    %cst = arith.constant dense<0.000000e+00> : vector<8x512xf32>
    %4 = tpu.matmul %1, %3, %cst {dimension_numbers = #tpu.dot_dimension_numbers<[1], [0], [0], [1], [0, 0, 1, 1], [], []>} : vector<8x784xbf16>, vector<784x512xbf16>, vector<8x512xf32> -> vector<8x512xf32>
    %5 = vector.broadcast %2 : vector<1x512xf32> to vector<8x512xf32>
    %6 = arith.addf %4, %5 : vector<8x512xf32>
    %cst_5 = arith.constant 0.000000e+00 : f32
    %7 = vector.broadcast %cst_5 : f32 to vector<8x512xf32>
    %8 = arith.maximumf %6, %7 : vector<8x512xf32>
    %9 = arith.truncf %8 : vector<8x512xf32> to vector<8x512xbf16>
    %c1 = arith.constant 1 : index
    %c0_6 = arith.constant 0 : index
    %10 = vector.load %arg7[%c1, %c0_6] : memref<5x512xf32, #tpu.memory_space<vmem>>, vector<1x256xf32>
    %c0_7 = arith.constant 0 : index
    %c0_8 = arith.constant 0 : index
    %11 = vector.load %arg3[%c0_7, %c0_8] : memref<512x256xbf16, #tpu.memory_space<vmem>>, vector<512x256xbf16>
    %cst_9 = arith.constant dense<0.000000e+00> : vector<8x256xf32>
    %12 = tpu.matmul %9, %11, %cst_9 {dimension_numbers = #tpu.dot_dimension_numbers<[1], [0], [0], [1], [0, 0, 1, 1], [], []>} : vector<8x512xbf16>, vector<512x256xbf16>, vector<8x256xf32> -> vector<8x256xf32>
    %13 = vector.broadcast %10 : vector<1x256xf32> to vector<8x256xf32>
    %14 = arith.addf %12, %13 : vector<8x256xf32>
    %cst_10 = arith.constant 0.000000e+00 : f32
    %15 = vector.broadcast %cst_10 : f32 to vector<8x256xf32>
    %16 = arith.maximumf %14, %15 : vector<8x256xf32>
    %17 = arith.truncf %16 : vector<8x256xf32> to vector<8x256xbf16>
    %c2 = arith.constant 2 : index
    %c0_11 = arith.constant 0 : index
    %18 = vector.load %arg7[%c2, %c0_11] : memref<5x512xf32, #tpu.memory_space<vmem>>, vector<1x128xf32>
    %c0_12 = arith.constant 0 : index
    %c0_13 = arith.constant 0 : index
    %19 = vector.load %arg4[%c0_12, %c0_13] : memref<256x128xbf16, #tpu.memory_space<vmem>>, vector<256x128xbf16>
    %cst_14 = arith.constant dense<0.000000e+00> : vector<8x128xf32>
    %20 = tpu.matmul %17, %19, %cst_14 {dimension_numbers = #tpu.dot_dimension_numbers<[1], [0], [0], [1], [0, 0, 1, 1], [], []>} : vector<8x256xbf16>, vector<256x128xbf16>, vector<8x128xf32> -> vector<8x128xf32>
    %21 = vector.broadcast %18 : vector<1x128xf32> to vector<8x128xf32>
    %22 = arith.addf %20, %21 : vector<8x128xf32>
    %cst_15 = arith.constant 0.000000e+00 : f32
    %23 = vector.broadcast %cst_15 : f32 to vector<8x128xf32>
    %24 = arith.maximumf %22, %23 : vector<8x128xf32>
    %25 = arith.truncf %24 : vector<8x128xf32> to vector<8x128xbf16>
    %c3 = arith.constant 3 : index
    %c0_16 = arith.constant 0 : index
    %26 = vector.load %arg7[%c3, %c0_16] : memref<5x512xf32, #tpu.memory_space<vmem>>, vector<1x128xf32>
    %c0_17 = arith.constant 0 : index
    %c0_18 = arith.constant 0 : index
    %27 = vector.load %arg5[%c0_17, %c0_18] : memref<128x128xbf16, #tpu.memory_space<vmem>>, vector<128x128xbf16>
    %cst_19 = arith.constant dense<0.000000e+00> : vector<8x128xf32>
    %28 = tpu.matmul %25, %27, %cst_19 {dimension_numbers = #tpu.dot_dimension_numbers<[1], [0], [0], [1], [0, 0, 1, 1], [], []>} : vector<8x128xbf16>, vector<128x128xbf16>, vector<8x128xf32> -> vector<8x128xf32>
    %29 = vector.broadcast %26 : vector<1x128xf32> to vector<8x128xf32>
    %30 = arith.addf %28, %29 : vector<8x128xf32>
    %cst_20 = arith.constant 0.000000e+00 : f32
    %31 = vector.broadcast %cst_20 : f32 to vector<8x128xf32>
    %32 = arith.maximumf %30, %31 : vector<8x128xf32>
    %33 = arith.truncf %32 : vector<8x128xf32> to vector<8x128xbf16>
    %c4 = arith.constant 4 : index
    %c0_21 = arith.constant 0 : index
    %34 = vector.load %arg7[%c4, %c0_21] : memref<5x512xf32, #tpu.memory_space<vmem>>, vector<1x128xf32>
    %c0_22 = arith.constant 0 : index
    %c0_23 = arith.constant 0 : index
    %35 = vector.load %arg6[%c0_22, %c0_23] : memref<128x128xbf16, #tpu.memory_space<vmem>>, vector<128x128xbf16>
    %cst_24 = arith.constant dense<0.000000e+00> : vector<8x128xf32>
    %36 = tpu.matmul %33, %35, %cst_24 {dimension_numbers = #tpu.dot_dimension_numbers<[1], [0], [0], [1], [0, 0, 1, 1], [], []>} : vector<8x128xbf16>, vector<128x128xbf16>, vector<8x128xf32> -> vector<8x128xf32>
    %37 = vector.broadcast %34 : vector<1x128xf32> to vector<8x128xf32>
    %38 = arith.addf %36, %37 : vector<8x128xf32>
    %39 = tpu.iota {dimensions = array<i32: 1>} : vector<8x128xi32>
    %c10_i32 = arith.constant 10 : i32
    %40 = vector.broadcast %c10_i32 : i32 to vector<8x128xi32>
    %41 = arith.cmpi slt, %39, %40 : vector<8x128xi32>
    %cst_25 = arith.constant -1.000000e+30 : f32
    %42 = vector.broadcast %cst_25 : f32 to vector<8x128xf32>
    %43 = arith.select %41, %38, %42 : vector<8x128xi1>, vector<8x128xf32>
    %cst_26 = arith.constant dense<0xFF800000> : vector<8xf32>
    %44 = vector.multi_reduction <maximumf>, %43, %cst_26 [1] : vector<8x128xf32> to vector<8xf32>
    %45 = vector.shape_cast %44 : vector<8xf32> to vector<8x1xf32>
    %46 = vector.broadcast %45 : vector<8x1xf32> to vector<8x128xf32>
    %47 = arith.subf %43, %46 : vector<8x128xf32>
    %48 = math.exp %47 : vector<8x128xf32>
    %cst_27 = arith.constant dense<0.000000e+00> : vector<8xf32>
    %49 = vector.multi_reduction <add>, %48, %cst_27 [1] : vector<8x128xf32> to vector<8xf32>
    %50 = vector.shape_cast %49 : vector<8xf32> to vector<8x1xf32>
    %51 = math.log %50 : vector<8x1xf32>
    %52 = vector.broadcast %51 : vector<8x1xf32> to vector<8x128xf32>
    %53 = arith.subf %47, %52 : vector<8x128xf32>
    %c0_28 = arith.constant 0 : index
    %c0_29 = arith.constant 0 : index
    %54 = vector.load %arg8[%c0_28, %c0_29] : memref<8x128xf32, #tpu.memory_space<vmem>>, vector<8x128xf32>
    tpu.vector_store %arg8[%c0_28, %c0_29], %53 {strides = array<i32>} : memref<8x128xf32, #tpu.memory_space<vmem>>, vector<8x128xf32>,
    return
  }
  func.func @transform_0(%arg0: i32) -> (i32, i32) {
    %c0_i32 = arith.constant 0 : i32
    %c0_i32_0 = arith.constant 0 : i32
    return %arg0, %c0_i32 : i32, i32
  }
  func.func @transform_1(%arg0: i32) -> (i32, i32) {
    %c0_i32 = arith.constant 0 : i32
    %c0_i32_0 = arith.constant 0 : i32
    %c0_i32_1 = arith.constant 0 : i32
    return %c0_i32, %c0_i32_0 : i32, i32
  }
  func.func @transform_2(%arg0: i32) -> (i32, i32) {
    %c0_i32 = arith.constant 0 : i32
    %c0_i32_0 = arith.constant 0 : i32
    %c0_i32_1 = arith.constant 0 : i32
    return %c0_i32, %c0_i32_0 : i32, i32
  }
  func.func @transform_3(%arg0: i32) -> (i32, i32) {
    %c0_i32 = arith.constant 0 : i32
    %c0_i32_0 = arith.constant 0 : i32
    %c0_i32_1 = arith.constant 0 : i32
    return %c0_i32, %c0_i32_0 : i32, i32
  }
  func.func @transform_4(%arg0: i32) -> (i32, i32) {
    %c0_i32 = arith.constant 0 : i32
    %c0_i32_0 = arith.constant 0 : i32
    %c0_i32_1 = arith.constant 0 : i32
    return %c0_i32, %c0_i32_0 : i32, i32
  }
  func.func @transform_5(%arg0: i32) -> (i32, i32) {
    %c0_i32 = arith.constant 0 : i32
    %c0_i32_0 = arith.constant 0 : i32
    %c0_i32_1 = arith.constant 0 : i32
    return %c0_i32, %c0_i32_0 : i32, i32
  }
  func.func @transform_6(%arg0: i32) -> (i32, i32) {
    %c0_i32 = arith.constant 0 : i32
    %c0_i32_0 = arith.constant 0 : i32
    %c0_i32_1 = arith.constant 0 : i32
    return %c0_i32, %c0_i32_0 : i32, i32
  }
  func.func @transform_7(%arg0: i32) -> (i32, i32) {
    %c0_i32 = arith.constant 0 : i32
    %c0_i32_0 = arith.constant 0 : i32
    return %arg0, %c0_i32 : i32, i32
  }
}

</mosaic_0001>

<bundles_post_ra>
// kernel: tpu_custom_call.1
= control target key start
LH: loop header
LB: loop body
LE: loop exit
PB: predicated region body
PF: predicated region fallthrough
CT: control target
= control target key end

     0   :  { %s4511_s0 = inlined_call_operand.hbm [shape: f32[16,784], index: 0, kind: input, shape index: {}]   ;;  %s4512_s1 = inlined_call_operand.hbm [shape: bf16[784,512], index: 1, kind: input, shape index: {}]   ;;  %s4513_s2 = inlined_call_operand.hbm [shape: bf16[512,256], index: 2, kind: input, shape index: {}]   ;;  %s4514_s3 = inlined_call_operand.hbm [shape: bf16[256,128], index: 3, kind: input, shape index: {}]   ;;  %s4515_s4 = inlined_call_operand.hbm [shape: bf16[128,128], index: 4, kind: input, shape index: {}]   ;;  %s4516_s5 = inlined_call_operand.hbm [shape: bf16[128,128], index: 5, kind: input, shape index: {}]   ;;  %s4517_s6 = inlined_call_operand.hbm [shape: f32[5,512], index: 6, kind: input, shape index: {}]   ;;  %s4518_s7 = inlined_call_operand.hbm [shape: f32[16,128], index: 7, kind: output, shape index: {}]  }
   0x1   :  { %4523 = sst [smem:[#allocation20_spill]] %s4512_s1 }
   0x2   :  { %4524 = sst [smem:[#allocation21_spill]] %s4513_s2 }
   0x3   :  { %12 = vsyncpa [#allocation3], 0 }
   0x4   :  { %14 = vsyncpa [#allocation3 + $0x1], 0 }
   0x5   :  { %15 = vsyncpa [#allocation6], 0 }
   0x6   :  { %16 = vsyncpa [#allocation9], 0 }
   0x7   :  { %17 = vsyncpa [#allocation12], 0 }
   0x8   :  { %18 = vsyncpa [#allocation4], 0 }
   0x9   :  { %20 = vsyncpa [#allocation4 + $0x1], 0  ;;  %s4215_s24 = smov 0   ;;  %s4217_s25 = smov 0  }
   0xa   :  { %s4219_s26 = smov 0   ;;  %s4221_s27 = smov 0  }
   0xb LB: > { %s4158_s28 = smov [#allocation5]   ;;  %s4236_s30 = sadd.s32 4294967295, %s4156_s27   ;;  %s4156_s27 = sphi %s4221_s27, %s4548_s27   ;;  %s4152_s26 = sphi %s4219_s26, %s4547_s26   ;;  %s4148_s25 = sphi %s4217_s25, %s4546_s25   ;;  %s4144_s24 = sphi %s4215_s24, %s4545_s24  }
   0xc   : > { %s221_s29 = sshll.u32 %s4158_s28, 4  ;;  %p2956_p0 = scmp.ge.s32.totalorder %s4156_s27, 1  ;;  %s222_s29 = int_to_ptr.vmem [resolvable:$true] %s221_s29 }
   0xd   : > { %p4519_p1 = scmp.eq.s32.totalorder %s4236_s30, 0  ;;  %p209_p2 = scmp.lt.s32.totalorder %s4156_s27, 3 }
   0xe   : > { %s4159_s9 = smov [#allocation8]   ;;  %s4160_s12 = smov [#allocation11]  }
   0xf   : > { %p4241_p3 = pnand %p2956_p0, %p209_p2  ;;  %s247_s10 = sshll.u32 %s4159_s9, 4  ;;  %s4254_s10 = int_to_ptr.vmem [resolvable:$true] %s247_s10 }
  0x10   : > { %s4256_s13 = sshll.u32 %s4160_s12, 4  ;;  %s3907_s15 = scalar_lea.vmem %s222_s29, 25088  ;;  %s274_s13 = int_to_ptr.vmem [resolvable:$true] %s4256_s13 }
  0x11   : > { %s4525_s8 = scalar_select %p4241_p3, 1, 0 }
  0x12   : > { %p3382_p5 = pneg %p4241_p3  ;;  %p3908_p8 = scmp.ne.s32.totalorder %s222_s29, %s3907_s15 }
  0x13   : > { %p3915_p11 = scmp.lt.s32.totalorder %s222_s29, %s222_s29  ;;  %p3916_p12 = scmp.lt.s32.totalorder %s3907_s15, %s3907_s15 }
  0x14   : > { %p4250_p6 = pnand %p3382_p5, %p4519_p1 }
  0x15   : > { %p3917_p13 = por %p3916_p12, %p3915_p11 }
  0x16   : > { %p4260_p7 = pneg %p4250_p6 }
  0x18   : > { %p3910_p9 = pnand %p3908_p8, %p4260_p7 }
  0x1a   : > { %p3911_p10 = pneg %p3910_p9 }
  0x1c   : > { %p3918_p0 = pnand %p3917_p13, %p3911_p10 }
  0x1e   : > { %3921 = shalt.err (!%p3918_p0)
}
  0x1f   : > { %s4161_s16 = smov 256   ;;  %s4162_s17 = smov 16  }
  0x20   : > { %s4528_s1 = sld [smem:[#allocation20_spill]]  ;;  %s3933_s20 = scalar_lea.vmem %s4254_s10, 2048 }
  0x21   : > { %p3934_p2 = scmp.ne.s32.totalorder %s4254_s10, %s3933_s20  ;;  %p3941_p9 = scmp.lt.s32.totalorder %s4254_s10, %s4254_s10 }
  0x22   : > { %p3942_p10 = scmp.lt.s32.totalorder %s3933_s20, %s3933_s20 }
  0x23   : > { %p3936_p5 = pnand %p3934_p2, %p4260_p7 }
  0x24   : > { %p3943_p11 = por %p3942_p10, %p3941_p9 }
  0x25   : > { %p3937_p8 = pneg %p3936_p5 }
  0x26   : > { %3385 = dma.hbm_to_vmem [thread:$0]  (!%p4250_p6), %s4528_s1, 25088, %s222_s29, [#allocation6], %s4161_s16, %s4161_s16, %s4162_s17  }
  0x27   : > { %p3944_p12 = pnand %p3943_p11, %p3937_p8 }
  0x29   : > { %3947 = shalt.err (!%p3944_p12)
}
  0x2a   : > { %s4163_s21 = smov 64   ;;  %s4164_s22 = smov 4  }
  0x2b   : > { %3391 = dma.hbm_to_vmem [thread:$0]  (!%p4250_p6), %s4514_s3, 2048, %s4254_s10, [#allocation9], %s4163_s21, %s4163_s21, %s4164_s22  }
  0x2c   : > { %s3959_s29 = scalar_lea.vmem %s274_s13, 1024  ;;  %p3967_p5 = scmp.lt.s32.totalorder %s274_s13, %s274_s13 }
  0x2d   : > { %p3960_p13 = scmp.ne.s32.totalorder %s274_s13, %s3959_s29  ;;  %p3968_p8 = scmp.lt.s32.totalorder %s3959_s29, %s3959_s29 }
  0x2f   : > { %p3962_p0 = pnand %p3960_p13, %p4260_p7  ;;  %p3969_p9 = por %p3968_p8, %p3967_p5 }
  0x31   : > { %p3963_p2 = pneg %p3962_p0 }
  0x33   : > { %p3970_p10 = pnand %p3969_p9, %p3963_p2 }
  0x35   : > { %3973 = shalt.err (!%p3970_p10)
}
  0x36   : > { %3397 = dma.hbm_to_vmem [thread:$0]  (!%p4250_p6), %s4516_s5, 1024, %s274_s13, [#allocation12], %s4163_s21, %s4163_s21, %s4164_s22  }
  0x37   : > { %s4165_s10 = smov [#allocation7]  }
  0x38   : > { %s234_s15 = sshll.u32 %s4165_s10, 4  ;;  %s235_s15 = int_to_ptr.vmem [resolvable:$true] %s234_s15 }
  0x39   : > { %s3985_s16 = scalar_lea.vmem %s235_s15, 8192  ;;  %p3993_p0 = scmp.lt.s32.totalorder %s235_s15, %s235_s15 }
  0x3a   : > { %p3986_p11 = scmp.ne.s32.totalorder %s235_s15, %s3985_s16  ;;  %p3994_p2 = scmp.lt.s32.totalorder %s3985_s16, %s3985_s16 }
  0x3c   : > { %p3988_p12 = pnand %p3986_p11, %p4260_p7  ;;  %p3995_p5 = por %p3994_p2, %p3993_p0 }
  0x3e   : > { %p3989_p13 = pneg %p3988_p12 }
  0x40   : > { %p3996_p8 = pnand %p3995_p5, %p3989_p13 }
  0x42   : > { %3999 = shalt.err (!%p3996_p8)
}
  0x43   : > { %s4166_s17 = smov 128   ;;  %s4167_s18 = smov 8  }
  0x44   : > { %s4529_s2 = sld [smem:[#allocation21_spill]]  ;;  %s4168_s20 = smov [#allocation10]  }
  0x45   : > { %s260_s23 = sshll.u32 %s4168_s20, 4  ;;  %s4169_s28 = smov [#allocation13]   ;;  %s261_s23 = int_to_ptr.vmem [resolvable:$true] %s260_s23 }
  0x46   : > { %s287_s29 = sshll.u32 %s4169_s28, 4  ;;  %s4011_s9 = scalar_lea.vmem %s261_s23, 1024  ;;  %s288_s29 = int_to_ptr.vmem [resolvable:$true] %s287_s29 }
  0x47   : > { %p4012_p9 = scmp.ne.s32.totalorder %s261_s23, %s4011_s9  ;;  %p4019_p12 = scmp.lt.s32.totalorder %s261_s23, %s261_s23 }
  0x48   : > { %p4020_p13 = scmp.lt.s32.totalorder %s4011_s9, %s4011_s9 }
  0x49   : > { %p4014_p10 = pnand %p4012_p9, %p4260_p7 }
  0x4a   : > { %3388 = dma.hbm_to_vmem [thread:$0]  (!%p4250_p6), %s4529_s2, 8192, %s235_s15, [#allocation6], %s4166_s17, %s4166_s17, %s4167_s18  }
  0x4b   : > { %p4015_p11 = pneg %p4014_p10  ;;  %p4021_p0 = por %p4020_p13, %p4019_p12 }
  0x4d   : > { %p4022_p2 = pnand %p4021_p0, %p4015_p11 }
  0x4f   : > { %4025 = shalt.err (!%p4022_p2)
}
  0x50   : > { %3394 = dma.hbm_to_vmem [thread:$0]  (!%p4250_p6), %s4515_s4, 1024, %s261_s23, [#allocation9], %s4163_s21, %s4163_s21, %s4164_s22  }
  0x51   : > { %s4037_s15 = scalar_lea.vmem %s288_s29, 512  ;;  %p4045_p10 = scmp.lt.s32.totalorder %s288_s29, %s288_s29 }
  0x52   : > { %p4038_p5 = scmp.ne.s32.totalorder %s288_s29, %s4037_s15  ;;  %p4046_p4 = scmp.lt.s32.totalorder %s4037_s15, %s4037_s15 }
  0x54   : > { %p4040_p8 = pnand %p4038_p5, %p4260_p7  ;;  %p4047_p12 = por %p4046_p4, %p4045_p10 }
  0x56   : > { %p4041_p9 = pneg %p4040_p8 }
  0x58   : > { %p4048_p11 = pnand %p4047_p12, %p4041_p9 }
  0x5a   : > { %4051 = shalt.err (!%p4048_p11)
}
  0x5b   : > { %3400 = dma.hbm_to_vmem [thread:$0]  (!%p4250_p6), %s4517_s6, 512, %s288_s29, [#allocation12]  }
  0x5c   : > { %s2955_s14 = sadd.s32 4294967294, %s4156_s27   ;;  %s4323_s11 = sadd.s32 1, %s4156_s27  }
  0x5d   : > { %s30_s21 = ssub.s32 %s4156_s27, %s4323_s11  ;;  %s33_s22 = sadd.s32 1, %s4152_s26 }
  0x5e   : > { %p31_p4 = scmp.eq.s32.totalorder %s30_s21, 0  ;;  %p40_p7 = scmp.ne.s32.totalorder %s4152_s26, %s4148_s25 }
  0x5f   : > { %p41_p13 = scmp.eq.s32.totalorder %s4156_s27, 0  ;;  %p46_p0 = scmp.ne.s32.totalorder %s4148_s25, %s4144_s24 }
  0x60   : > { %s4334_s18 = scalar_select %p31_p4, %s4152_s26, %s33_s22  }
  0x61   : > { %p42_p2 = por %p41_p13, %p40_p7  ;;  %p4338_p5 = por %p4519_p1, %p46_p0 }
  0x62   : > { %p196_p6 = scmp.eq.s32.totalorder %s4236_s30, 1  ;;  %p202_p8 = scmp.eq.s32.totalorder %s2955_s14, 1 }
  0x63   : > { %s4530_s19 = scalar_select %p4338_p5, 1, 0 }
  0x64   : > { %p3415_p9 = scmp.lt.s32.totalorder %s4156_s27, 2  ;;  %s298_s13 = sand.u32 1, %s4152_s26  }
  0x65   : > { %p4345_p10 = por %p196_p6, %p40_p7  ;;  %p4349_p12 = por %p202_p8, %p46_p0 }
  0x66   : > { %s3351_s28 = smul.u32 56, %s298_s13  ;;  %p4354_p11 = pnand %p3415_p9, %p42_p2 }
  0x67   : > { %s4531_s20 = scalar_select %p4345_p10, 1, 0 }
  0x68   : > { %s4532_s23 = scalar_select %p4349_p12, 1, 0 }
  0x69   : > { %s3352_s29 = smul.u32 896, %s4156_s27  ;;  %s302_s16 = scalar_lea.vmem [#allocation2], %s3351_s28 }
  0x6a   : > { %s310_s17 = sshll.u32 %s302_s16, 4  ;;  %s299_s14 = scalar_lea.sflag [#allocation3], %s298_s13  ;;  %s311_s17 = int_to_ptr.vmem [resolvable:$true] %s310_s17 }
  0x6b   : > { %s4361_s15 = scalar_lea.hbm %s4511_s0, %s3352_s29  ;;  %p4054_p7 = pneg %p4354_p11 }
  0x6c   : > { %s4052_s21 = scalar_lea.hbm %s4361_s15, 896  ;;  %s4057_s12 = scalar_lea.hbm %s4511_s0, 1792 }
  0x6d   : > { %p4053_p4 = scmp.ne.s32.totalorder %s4361_s15, %s4052_s21  ;;  %p4058_p2 = scmp.lt.s32.totalorder %s4361_s15, %s4511_s0 }
  0x6e   : > { %p4059_p6 = scmp.lt.s32.totalorder %s4057_s12, %s4052_s21 }
  0x6f   : > { %p4055_p13 = pnand %p4054_p7, %p4053_p4 }
  0x70   : > { %p4060_p8 = por %p4059_p6, %p4058_p2 }
  0x71   : > { %p4056_p0 = pneg %p4055_p13 }
  0x73   : > { %p4061_p9 = pnand %p4060_p8, %p4056_p0 }
  0x75   : > { %4064 = shalt.err (!%p4061_p9)
}
  0x76   : > { %s4065_s28 = scalar_lea.vmem %s311_s17, 896  ;;  %s4170_s13 = smov [#allocation2]  }
  0x77   : > { %p4066_p1 = scmp.ne.s32.totalorder %s311_s17, %s4065_s28  ;;  %s4070_s16 = sshll.u32 %s4170_s13, 4  ;;  %s4071_s16 = int_to_ptr.vmem [resolvable:$false] %s4070_s16 }
  0x78   : > { %s4072_s2 = scalar_lea.vmem %s4071_s16, 1792  ;;  %p4073_p4 = scmp.lt.s32.totalorder %s311_s17, %s4071_s16 }
  0x79   : > { %p4068_p12 = pnand %p4066_p1, %p4054_p7  ;;  %p4074_p13 = scmp.lt.s32.totalorder %s4072_s2, %s4065_s28 }
  0x7b   : > { %p4069_p10 = pneg %p4068_p12  ;;  %p4075_p5 = por %p4074_p13, %p4073_p4 }
  0x7d   : > { %p4076_p3 = pnand %p4075_p5, %p4069_p10 }
  0x7f   : > { %4079 = shalt.err (!%p4076_p3)
}
  0x80   : > { %3404 = dma.hbm_to_vmem [thread:$0]  (!%p4354_p11), %s4361_s15, 896, %s311_s17, %s299_s14  }
  0x81   : > { %p4534_p0 = scmp.ne.s32.totalorder %s4525_s8, 0 }
  0x82   : > { %s4380_s1 = sand.u32 (!%p4534_p0), 1, %s4148_s25   ;;  %p4535_p1 = scmp.ne.s32.totalorder (!%p4534_p0), %s4530_s19, 0 }
  0x83   : > { %319 = sbr.rel (%p4534_p0) target bundleno = 1683 (0x693), region = 48  ;;  %s322_s22 = scalar_lea.sflag (!%p4534_p0), [#allocation3], %s4380_s1 }
  0x84   : > { %s3353_s21 = smul.u32 (!%p4534_p0), 56, %s4380_s1 }
  0x86   : > { %s4384_s12 = scalar_lea.vmem (!%p4534_p0), [#allocation2], %s3353_s21 }
  0x88   : > { %4123 = dma.done.wait (%p4535_p1), %s322_s22, 896  }
  0x89   : > { %4125 = vsyncadd (%p4535_p1), %s322_s22, 4294966400  ;;  %p4536_p3 = scmp.eq.s32.totalorder %s4236_s30, 0 }
  0x8b   : > { %4127 = dma.done.wait (%p4536_p3), [#allocation6], 33280   ;;  %p4537_p5 = pmov %p4536_p3 }
  0x8c   : > { %p4538_p10 = pmov %p4536_p3 }
  0x8d   : > { %4129 = vsyncadd (%p4537_p5), [#allocation6], 4294934016 }
  0x8e   : > { %4131 = dma.done.wait (%p4538_p10), [#allocation9], 3072   ;;  %p4539_p12 = pmov %p4536_p3 }
  0x8f   : > { %p4540_p11 = pmov %p4536_p3 }
  0x90   : > { %4133 = vsyncadd (%p4539_p12), [#allocation9], 4294964224 }
  0x91   : > { %4135 = dma.done.wait (%p4540_p11), [#allocation12], 1536   ;;  %p4541_p7 = pmov %p4536_p3 }
  0x92   : > { %v3470_v0 = vld [vmem:[#allocation5 + $0xe4] ss:$16 sps:$4 sm:$0xff]   ;;  %v3474_v2 = vld [vmem:[#allocation5 + $0xe0] ss:$16 sps:$4 sm:$0xff]   ;;  %vm1593_vm0 = vcmask 130048   ;;  %vm4173_vm1 = vmmov 0  }
  0x93   : > { %4137 = vsyncadd (%p4541_p7), [#allocation12], 4294965760  ;;  %v3472_v1 = vld [vmem:[#allocation5 + $0x2e4] ss:$16 sps:$4 sm:$0xff]   ;;  %1597 = vmatprep.subr.bf16.mxu0 %v3470_v0  ;;  %v3475_v3 = vld [vmem:[#allocation5 + $0x2e0] ss:$16 sps:$4 sm:$0xff]  }
  0x94   : > { %1638 = vmatprep.subr.bf16.mxu1 %v3472_v1  ;;  %v3476_v4 = vld [vmem:[#allocation5 + $0xc4] ss:$16 sps:$4 sm:$0xff]   ;;  %1598 = vmatpush1.bf16.msra.mxu0 %v3474_v2  ;;  %v3480_v6 = vld [vmem:[#allocation5 + $0xc0] ss:$16 sps:$4 sm:$0xff]   ;;  %s2972_s2 = sshll.u32 %s4380_s1, 3  ;;  %s3268_s8 = sshll.u32 %s4236_s30, 7 }
  0x95   : > { %1639 = vmatpush1.bf16.msra.mxu1 %v3475_v3  ;;  %v3478_v5 = vld [vmem:[#allocation5 + $0x2c4] ss:$16 sps:$4 sm:$0xff]   ;;  %1599 = vmatprep.subr.bf16.mxu0 %v3476_v4  ;;  %v3481_v7 = vld [vmem:[#allocation5 + $0x2c0] ss:$16 sps:$4 sm:$0xff]   ;;  %s379_s19 = scalar_lea.vmem [#allocation14], %s2972_s2  ;;  %s2826_s14 = scalar_lea.hbm %s4518_s7, %s3268_s8 }
  0x96   : > { %1640 = vmatprep.subr.bf16.mxu1 %v3478_v5  ;;  %v3482_v8 = vld [vmem:[#allocation5 + $0xa4] ss:$16 sps:$4 sm:$0xff]   ;;  %v3486_v10 = vld [vmem:[#allocation5 + $0xa0] ss:$16 sps:$4 sm:$0xff]   ;;  %s2828_s9 = sshll.u32 %s379_s19, 4  ;;  %s2815_s10 = scalar_lea.sflag [#allocation4], %s4380_s1  ;;  %s2829_s9 = int_to_ptr.vmem [resolvable:$true] %s2828_s9 }
  0x97   : > { %v3484_v9 = vld [vmem:[#allocation5 + $0x2a4] ss:$16 sps:$4 sm:$0xff]   ;;  %v3487_v11 = vld [vmem:[#allocation5 + $0x2a0] ss:$16 sps:$4 sm:$0xff]   ;;  %s4080_s29 = scalar_lea.vmem %s2829_s9, 128  ;;  %p4542_p6 = scmp.ne.s32.totalorder %s4531_s20, 0 }
  0x98   : > { %1600 = vmatpush1.bf16.msra.mxu0 %v3480_v6  ;;  %v3488_v12 = vld [vmem:[#allocation5 + $0x84] ss:$16 sps:$4 sm:$0xff]   ;;  %v3492_v14 = vld [vmem:[#allocation5 + $0x80] ss:$16 sps:$4 sm:$0xff]   ;;  %p4081_p2 = scmp.ne.s32.totalorder %s2829_s9, %s4080_s29  ;;  %s4174_s28 = smov [#allocation14]  }
  0x99   : > { %1641 = vmatpush1.bf16.msra.mxu1 %v3481_v7  ;;  %1601 = vmatprep.subr.bf16.mxu0 %v3482_v8  ;;  %v3490_v13 = vld [vmem:[#allocation5 + $0x284] ss:$16 sps:$4 sm:$0xff]   ;;  %v3493_v15 = vld [vmem:[#allocation5 + $0x280] ss:$16 sps:$4 sm:$0xff]   ;;  %s4084_s13 = sshll.u32 %s4174_s28, 4  ;;  %s4085_s13 = int_to_ptr.vmem [resolvable:$false] %s4084_s13 }
  0x9a   : > { %1642 = vmatprep.subr.bf16.mxu1 %v3484_v9  ;;  %v3494_v16 = vld [vmem:[#allocation5 + $0x64] ss:$16 sps:$4 sm:$0xff]   ;;  %v3498_v18 = vld [vmem:[#allocation5 + $0x60] ss:$16 sps:$4 sm:$0xff]   ;;  %p4082_p8 = pnand %p4081_p2, %p4542_p6  ;;  %s4086_s30 = scalar_lea.vmem %s4085_s13, 256 }
  0x9b   : > { %v3496_v17 = vld [vmem:[#allocation5 + $0x264] ss:$16 sps:$4 sm:$0xff]   ;;  %v3499_v19 = vld [vmem:[#allocation5 + $0x260] ss:$16 sps:$4 sm:$0xff]   ;;  %p4087_p4 = scmp.lt.s32.totalorder %s2829_s9, %s4085_s13  ;;  %p4088_p13 = scmp.lt.s32.totalorder %s4086_s30, %s4080_s29 }
  0x9c   : > { %1602 = vmatpush1.bf16.msra.mxu0 %v3486_v10  ;;  %v3500_v20 = vld [vmem:[#allocation5 + $0x44] ss:$16 sps:$4 sm:$0xff]   ;;  %v3504_v22 = vld [vmem:[#allocation5 + $0x40] ss:$16 sps:$4 sm:$0xff]   ;;  %p4083_p9 = pneg %p4082_p8 }
  0x9d   : > { %1643 = vmatpush1.bf16.msra.mxu1 %v3487_v11  ;;  %1603 = vmatprep.subr.bf16.mxu0 %v3488_v12  ;;  %v3502_v21 = vld [vmem:[#allocation5 + $0x244] ss:$16 sps:$4 sm:$0xff]   ;;  %v3505_v23 = vld [vmem:[#allocation5 + $0x240] ss:$16 sps:$4 sm:$0xff]   ;;  %p4089_p0 = por %p4088_p13, %p4087_p4 }
  0x9e   : > { %1644 = vmatprep.subr.bf16.mxu1 %v3490_v13  ;;  %v3506_v24 = vld [vmem:[#allocation5 + $0x24] ss:$16 sps:$4 sm:$0xff]   ;;  %v3510_v26 = vld [vmem:[#allocation5 + $0x20] ss:$16 sps:$4 sm:$0xff]   ;;  %v3577_v13 = vld [vmem:[#allocation5 + $0xec] ss:$16 sps:$4 sm:$0xff]  }
  0x9f   : > { %v3508_v25 = vld [vmem:[#allocation5 + $0x224] ss:$16 sps:$4 sm:$0xff]   ;;  %v3511_v27 = vld [vmem:[#allocation5 + $0x220] ss:$16 sps:$4 sm:$0xff]   ;;  %p4090_p1 = pnand %p4089_p0, %p4083_p9 }
  0xa0   : > { %1604 = vmatpush1.bf16.msra.mxu0 %v3492_v14  ;;  %v3512_v28 = vld [vmem:[#allocation5 + $0x4] ss:$16 sps:$4 sm:$0xff]   ;;  %v3516_v30 = vld [vmem:[#allocation5] ss:$16 sps:$4 sm:$0xff]  }
  0xa1   : > { %1645 = vmatpush1.bf16.msra.mxu1 %v3493_v15  ;;  %1605 = vmatprep.subr.bf16.mxu0 %v3494_v16  ;;  %v3514_v29 = vld [vmem:[#allocation5 + $0x204] ss:$16 sps:$4 sm:$0xff]   ;;  %v3517_v31 = vld [vmem:[#allocation5 + $0x200] ss:$16 sps:$4 sm:$0xff]   ;;  %v4171_v16 = vmov 0  }
  0xa2   : > { %1646 = vmatprep.subr.bf16.mxu1 %v3496_v17  ;;  %v3518_v32 = vld [vmem:[#allocation5 + $0x1e4] ss:$16 sps:$4 sm:$0xff]   ;;  %v3522_v34 = vld [vmem:[#allocation5 + $0x1e0] ss:$16 sps:$4 sm:$0xff]  }
  0xa3   : > { %v3520_v33 = vld [vmem:[#allocation5 + $0x3e4] ss:$16 sps:$4 sm:$0xff]   ;;  %v3523_v35 = vld [vmem:[#allocation5 + $0x3e0] ss:$16 sps:$4 sm:$0xff]  }
  0xa4   : > { %1606 = vmatpush1.bf16.msra.mxu0 %v3498_v18  ;;  %v3524_v36 = vld [vmem:[#allocation5 + $0x1c4] ss:$16 sps:$4 sm:$0xff]   ;;  %v3528_v38 = vld [vmem:[#allocation5 + $0x1c0] ss:$16 sps:$4 sm:$0xff]   ;;  %v3575_v18 = vld [vmem:[#allocation5 + $0xe8] ss:$16 sps:$4 sm:$0xff]  }
  0xa5   : > { %1647 = vmatpush1.bf16.msra.mxu1 %v3499_v19  ;;  %1607 = vmatprep.subr.bf16.mxu0 %v3500_v20  ;;  %v3526_v37 = vld [vmem:[#allocation5 + $0x3c4] ss:$16 sps:$4 sm:$0xff]   ;;  %v3529_v39 = vld [vmem:[#allocation5 + $0x3c0] ss:$16 sps:$4 sm:$0xff]  }
  0xa6   : > { %1648 = vmatprep.subr.bf16.mxu1 %v3502_v21  ;;  %v3530_v40 = vld [vmem:[#allocation5 + $0x1a4] ss:$16 sps:$4 sm:$0xff]   ;;  %v3534_v42 = vld [vmem:[#allocation5 + $0x1a0] ss:$16 sps:$4 sm:$0xff]   ;;  %v3583_v21 = vld [vmem:[#allocation5 + $0xcc] ss:$16 sps:$4 sm:$0xff]  }
  0xa7   : > { %v3532_v41 = vld [vmem:[#allocation5 + $0x3a4] ss:$16 sps:$4 sm:$0xff]   ;;  %v3535_v43 = vld [vmem:[#allocation5 + $0x3a0] ss:$16 sps:$4 sm:$0xff]  }
  0xa8   : > { %1608 = vmatpush1.bf16.msra.mxu0 %v3504_v22  ;;  %v3536_v44 = vld [vmem:[#allocation5 + $0x184] ss:$16 sps:$4 sm:$0xff]   ;;  %v3540_v47 = vld [vmem:[#allocation5 + $0x180] ss:$16 sps:$4 sm:$0xff]  }
  0xa9   : > { %1649 = vmatpush1.bf16.msra.mxu1 %v3505_v23  ;;  %1609 = vmatprep.subr.bf16.mxu0 %v3506_v24  ;;  %v3538_v45 = vld [vmem:[#allocation5 + $0x384] ss:$16 sps:$4 sm:$0xff]   ;;  %v3541_v48 = vld [vmem:[#allocation5 + $0x380] ss:$16 sps:$4 sm:$0xff]   ;;  %v3581_v23 = vld [vmem:[#allocation5 + $0xc8] ss:$16 sps:$4 sm:$0xff]  }
  0xaa   : > { %1650 = vmatprep.subr.bf16.mxu1 %v3508_v25  ;;  %v382_v46 = vld [vmem:[%s4384_s12 + $0x8] sm:$0xff]  ;;  %v384_v50 = vld [vmem:[%s4384_s12 + $0x18] sm:$0xff]  ;;  %v381_v4 = vld [vmem:[%s4384_s12] sm:$0xff] }
  0xab   : > { %v4403_v49 = vpack.c.bf16 %v382_v46, %v382_v46  ;;  %v3542_v51 = vld [vmem:[#allocation5 + $0x164] ss:$16 sps:$4 sm:$0xff]   ;;  %v4406_v52 = vpack.c.bf16 %v384_v50, %v384_v50  ;;  %v3546_v54 = vld [vmem:[#allocation5 + $0x160] ss:$16 sps:$4 sm:$0xff]   ;;  %v4412_v8 = vpack.c.bf16 %v381_v4, %v381_v4  ;;  %v3589_v25 = vld [vmem:[#allocation5 + $0xac] ss:$16 sps:$4 sm:$0xff]  }
  0xac   : > { %1610 = vmatpush1.bf16.msra.mxu0 %v3510_v26  ;;  %v3544_v53 = vld [vmem:[#allocation5 + $0x364] ss:$16 sps:$4 sm:$0xff]   ;;  %v3547_v55 = vld [vmem:[#allocation5 + $0x360] ss:$16 sps:$4 sm:$0xff]   ;;  %v3649_v4 = vld [vmem:[#allocation5 + $0x16c] ss:$16 sps:$4 sm:$0xff]  }
  0xad   : > { %1651 = vmatpush1.bf16.msra.mxu1 %v3511_v27  ;;  %1611 = vmatprep.subr.bf16.mxu0 %v3512_v28  ;;  %v3548_v56 = vld [vmem:[#allocation5 + $0x144] ss:$16 sps:$4 sm:$0xff]   ;;  %v3552_v58 = vld [vmem:[#allocation5 + $0x140] ss:$16 sps:$4 sm:$0xff]   ;;  %v3587_v27 = vld [vmem:[#allocation5 + $0xa8] ss:$16 sps:$4 sm:$0xff]  }
  0xae   : > { %1652 = vmatprep.subr.bf16.mxu1 %v3514_v29  ;;  %1629 = vmatprep.mubr.bf16.mxu0 %v4403_v49  ;;  %v3550_v57 = vld [vmem:[#allocation5 + $0x344] ss:$16 sps:$4 sm:$0xff]   ;;  %v3553_v59 = vld [vmem:[#allocation5 + $0x340] ss:$16 sps:$4 sm:$0xff]   ;;  %v3595_v29 = vld [vmem:[#allocation5 + $0x8c] ss:$16 sps:$4 sm:$0xff]  }
  0xaf   : > { %1670 = vmatprep.mubr.bf16.mxu1 %v4406_v52  ;;  %v3554_v60 = vld [vmem:[#allocation5 + $0x124] ss:$16 sps:$4 sm:$0xff]   ;;  %v3558_v62 = vld [vmem:[#allocation5 + $0x120] ss:$16 sps:$4 sm:$0xff]  }
  0xb0   : > { %1612 = vmatpush1.bf16.msra.mxu0 %v3516_v30  ;;  %v3556_v61 = vld [vmem:[#allocation5 + $0x324] ss:$16 sps:$4 sm:$0xff]   ;;  %v3559_v63 = vld [vmem:[#allocation5 + $0x320] ss:$16 sps:$4 sm:$0xff]  }
  0xb1   : > { %1653 = vmatpush1.bf16.msra.mxu1 %v3517_v31  ;;  %1613 = vmatprep.subr.bf16.mxu0 %v3518_v32  ;;  %v3560_v0 = vld [vmem:[#allocation5 + $0x104] ss:$16 sps:$4 sm:$0xff]   ;;  %v3564_v2 = vld [vmem:[#allocation5 + $0x100] ss:$16 sps:$4 sm:$0xff]   ;;  %v3593_v31 = vld [vmem:[#allocation5 + $0x88] ss:$16 sps:$4 sm:$0xff]  }
  0xb2   : > { %1654 = vmatprep.subr.bf16.mxu1 %v3520_v33  ;;  %v3562_v1 = vld [vmem:[#allocation5 + $0x304] ss:$16 sps:$4 sm:$0xff]   ;;  %v3565_v3 = vld [vmem:[#allocation5 + $0x300] ss:$16 sps:$4 sm:$0xff]   ;;  %v3601_v33 = vld [vmem:[#allocation5 + $0x6c] ss:$16 sps:$4 sm:$0xff]  }
  0xb3   : > { %v383_v5 = vld [vmem:[%s4384_s12 + $0x10] sm:$0xff] }
  0xb4   : > { %1614 = vmatpush2.bf16.msra.mxu0 %v3522_v34  ;;  %v3568_v6 = vld [vmem:[#allocation5 + $0x4e4] ss:$16 sps:$4 sm:$0xff]   ;;  %v4414_v9 = vpack.c.bf16 %v383_v5, %v383_v5  ;;  %v3566_v10 = vld [vmem:[#allocation5 + $0x4e0] ss:$16 sps:$4 sm:$0xff]  }
  0xb5   : > { %1655 = vmatpush2.bf16.msra.mxu1 %v3523_v35  ;;  %1615 = vmatprep.subr.bf16.mxu0 %v3524_v36  ;;  %v3571_v7 = vld [vmem:[#allocation5 + $0x604] ss:$16 sps:$4 sm:$0xff]   ;;  %v3569_v11 = vld [vmem:[#allocation5 + $0x600] ss:$16 sps:$4 sm:$0xff]  }
  0xb6   : > { %1656 = vmatprep.subr.bf16.mxu1 %v3526_v37  ;;  %v3574_v12 = vld [vmem:[#allocation5 + $0x4c4] ss:$16 sps:$4 sm:$0xff]   ;;  %v3572_v14 = vld [vmem:[#allocation5 + $0x4c0] ss:$16 sps:$4 sm:$0xff]   ;;  %v3599_v37 = vld [vmem:[#allocation5 + $0x68] ss:$16 sps:$4 sm:$0xff]  }
  0xb7   : > { %v387_v15 = vld [vmem:[%s4384_s12 + $0x30] sm:$0xff]  ;;  %v386_v35 = vld [vmem:[%s4384_s12 + $0x28] sm:$0xff] }
  0xb8   : > { %1616 = vmatpush2.bf16.msra.mxu0 %v3528_v38  ;;  %v3580_v17 = vld [vmem:[#allocation5 + $0x4a4] ss:$16 sps:$4 sm:$0xff]   ;;  %v4420_v19 = vpack.c.bf16 %v387_v15, %v387_v15  ;;  %v3578_v20 = vld [vmem:[#allocation5 + $0x4a0] ss:$16 sps:$4 sm:$0xff]   ;;  %v4426_v36 = vpack.c.bf16 %v386_v35, %v386_v35  ;;  %v3688_v35 = vld [vmem:[#allocation5 + $0x26c] ss:$16 sps:$4 sm:$0xff]  }
  0xb9   : > { %1657 = vmatpush2.bf16.msra.mxu1 %v3529_v39  ;;  %1617 = vmatprep.subr.bf16.mxu0 %v3530_v40  ;;  %v3586_v22 = vld [vmem:[#allocation5 + $0x484] ss:$16 sps:$4 sm:$0xff]   ;;  %v3584_v24 = vld [vmem:[#allocation5 + $0x480] ss:$16 sps:$4 sm:$0xff]   ;;  %v3607_v39 = vld [vmem:[#allocation5 + $0x4c] ss:$16 sps:$4 sm:$0xff]  }
  0xba   : > { %1658 = vmatprep.subr.bf16.mxu1 %v3532_v41  ;;  %v3592_v26 = vld [vmem:[#allocation5 + $0x464] ss:$16 sps:$4 sm:$0xff]   ;;  %v3590_v28 = vld [vmem:[#allocation5 + $0x460] ss:$16 sps:$4 sm:$0xff]   ;;  %v3605_v41 = vld [vmem:[#allocation5 + $0x48] ss:$16 sps:$4 sm:$0xff]  }
  0xbb   : > { %v3598_v30 = vld [vmem:[#allocation5 + $0x444] ss:$16 sps:$4 sm:$0xff]   ;;  %v3596_v32 = vld [vmem:[#allocation5 + $0x440] ss:$16 sps:$4 sm:$0xff]  }
  0xbc   : > { %1618 = vmatpush2.bf16.msra.mxu0 %v3534_v42  ;;  %v3604_v34 = vld [vmem:[#allocation5 + $0x424] ss:$16 sps:$4 sm:$0xff]   ;;  %v3602_v38 = vld [vmem:[#allocation5 + $0x420] ss:$16 sps:$4 sm:$0xff]  }
  0xbd   : > { %1659 = vmatpush2.bf16.msra.mxu1 %v3535_v43  ;;  %1619 = vmatprep.subr.bf16.mxu0 %v3536_v44  ;;  %v3610_v40 = vld [vmem:[#allocation5 + $0x404] ss:$16 sps:$4 sm:$0xff]   ;;  %v3608_v42 = vld [vmem:[#allocation5 + $0x400] ss:$16 sps:$4 sm:$0xff]   ;;  %v3613_v43 = vld [vmem:[#allocation5 + $0x2c] ss:$16 sps:$4 sm:$0xff]  }
  0xbe   : > { %1660 = vmatprep.subr.bf16.mxu1 %v3538_v45  ;;  %v3616_v44 = vld [vmem:[#allocation5 + $0x5e4] ss:$16 sps:$4 sm:$0xff]   ;;  %v3611_v45 = vld [vmem:[#allocation5 + $0x28] ss:$16 sps:$4 sm:$0xff]   ;;  %v3614_v46 = vld [vmem:[#allocation5 + $0x5e0] ss:$16 sps:$4 sm:$0xff]  }
  0xbf   : > { %v3620_v50 = vld [vmem:[#allocation5 + $0x5c0] ss:$16 sps:$4 sm:$0xff]   ;;  %v3652_v5 = vld [vmem:[#allocation5 + $0x524] ss:$16 sps:$4 sm:$0xff]  }
  0xc0   : > { %1620 = vmatpush2.bf16.msra.mxu0 %v3540_v47  ;;  %v3619_v47 = vld [vmem:[#allocation5 + $0xc] ss:$16 sps:$4 sm:$0xff]  }
  0xc1   : > { %1661 = vmatpush2.bf16.msra.mxu1 %v3541_v48  ;;  %1621 = vmatprep.subr.bf16.mxu0 %v3542_v51  ;;  %v3622_v48 = vld [vmem:[#allocation5 + $0x5c4] ss:$16 sps:$4 sm:$0xff]   ;;  %v3625_v51 = vld [vmem:[#allocation5 + $0x1ec] ss:$16 sps:$4 sm:$0xff]  }
  0xc2   : > { %1662 = vmatprep.subr.bf16.mxu1 %v3544_v53  ;;  %v3628_v53 = vld [vmem:[#allocation5 + $0x5a4] ss:$16 sps:$4 sm:$0xff]  }
  0xc3   : > { %v385_v15 = vld [vmem:[%s4384_s12 + $0x20] sm:$0xff] }
  0xc4   : > { %1622 = vmatpush2.bf16.msra.mxu0 %v3546_v54  ;;  %v3623_v54 = vld [vmem:[#allocation5 + $0x1e8] ss:$16 sps:$4 sm:$0xff]  }
  0xc5   : > { %1663 = vmatpush2.bf16.msra.mxu1 %v3547_v55  ;;  %1623 = vmatprep.subr.bf16.mxu0 %v3548_v56  ;;  %v3626_v55 = vld [vmem:[#allocation5 + $0x5a0] ss:$16 sps:$4 sm:$0xff]   ;;  %v3631_v56 = vld [vmem:[#allocation5 + $0x1cc] ss:$16 sps:$4 sm:$0xff]  }
  0xc6   : > { %1664 = vmatprep.subr.bf16.mxu1 %v3550_v57  ;;  %v3634_v57 = vld [vmem:[#allocation5 + $0x584] ss:$16 sps:$4 sm:$0xff]  }
  0xc8   : > { %1624 = vmatpush2.bf16.msra.mxu0 %v3552_v58  ;;  %v3629_v58 = vld [vmem:[#allocation5 + $0x1c8] ss:$16 sps:$4 sm:$0xff]  }
  0xc9   : > { %1665 = vmatpush2.bf16.msra.mxu1 %v3553_v59  ;;  %1625 = vmatprep.subr.bf16.mxu0 %v3554_v60  ;;  %v3632_v59 = vld [vmem:[#allocation5 + $0x580] ss:$16 sps:$4 sm:$0xff]   ;;  %v3637_v60 = vld [vmem:[#allocation5 + $0x1ac] ss:$16 sps:$4 sm:$0xff]  }
  0xca   : > { %1666 = vmatprep.subr.bf16.mxu1 %v3556_v61  ;;  %v3640_v61 = vld [vmem:[#allocation5 + $0x564] ss:$16 sps:$4 sm:$0xff]  }
  0xcc   : > { %1626 = vmatpush2.bf16.msra.mxu0 %v3558_v62  ;;  %v3635_v62 = vld [vmem:[#allocation5 + $0x1a8] ss:$16 sps:$4 sm:$0xff]  }
  0xcd   : > { %1667 = vmatpush2.bf16.msra.mxu1 %v3559_v63  ;;  %1627 = vmatprep.subr.bf16.mxu0 %v3560_v0  ;;  %v3638_v63 = vld [vmem:[#allocation5 + $0x560] ss:$16 sps:$4 sm:$0xff]   ;;  %v3643_v0 = vld [vmem:[#allocation5 + $0x18c] ss:$16 sps:$4 sm:$0xff]  }
  0xce   : > { %1668 = vmatprep.subr.bf16.mxu1 %v3562_v1  ;;  %v3646_v1 = vld [vmem:[#allocation5 + $0x544] ss:$16 sps:$4 sm:$0xff]  }
  0xd0   : > { %1628 = vmatpush2.bf16.msra.mxu0 %v3564_v2  ;;  %v3641_v2 = vld [vmem:[#allocation5 + $0x188] ss:$16 sps:$4 sm:$0xff]  }
  0xd1   : > { %1669 = vmatpush2.bf16.msra.mxu1 %v3565_v3  ;;  %1679 = vmatprep.subr.bf16.mxu0 %v3568_v6  ;;  %v3644_v3 = vld [vmem:[#allocation5 + $0x540] ss:$16 sps:$4 sm:$0xff]   ;;  %v3647_v6 = vld [vmem:[#allocation5 + $0x168] ss:$16 sps:$4 sm:$0xff]  }
  0xd2   : > { %1734 = vmatprep.subr.bf16.mxu1 %v3571_v7  ;;  %v3650_v7 = vld [vmem:[#allocation5 + $0x520] ss:$16 sps:$4 sm:$0xff]  }
  0xd3   : > { %1630 = vmatmul.mubr.bf16.vlgmr.msra.gmra.mxu0 %v4412_v8 }
  0xd4   : > { %1671 = vmatmul.mubr.bf16.vlgmr.msra.gmra.mxu1 %v4414_v9  ;;  %1680 = vmatpush1.bf16.msra.mxu0 %v3566_v10  ;;  %v3655_v10 = vld [vmem:[#allocation5 + $0x14c] ss:$16 sps:$4 sm:$0xff]  }
  0xd5   : > { %1735 = vmatpush1.bf16.msra.mxu1 %v3569_v11  ;;  %1681 = vmatprep.subr.bf16.mxu0 %v3574_v12  ;;  %v3658_v11 = vld [vmem:[#allocation5 + $0x504] ss:$16 sps:$4 sm:$0xff]   ;;  %v3653_v12 = vld [vmem:[#allocation5 + $0x148] ss:$16 sps:$4 sm:$0xff]  }
  0xd6   : > { %1752 = vmatprep.mubr.bf16.mxu1 %v4171_v16  ;;  %1761 = vmatprep.subr.bf16.mxu1 %v3577_v13  ;;  %v3656_v13 = vld [vmem:[#allocation5 + $0x500] ss:$16 sps:$4 sm:$0xff]  }
  0xd7   : > { %1711 = vmatprep.mubr.bf16.mxu0 %v4426_v36 }
  0xd8   : > { %1682 = vmatpush1.bf16.msra.mxu0 %v3572_v14  ;;  %v3661_v14 = vld [vmem:[#allocation5 + $0x12c] ss:$16 sps:$4 sm:$0xff]  }
  0xd9   : > { %1683 = vmatprep.subr.bf16.mxu0 %v3580_v17  ;;  %v3664_v17 = vld [vmem:[#allocation5 + $0x2ec] ss:$16 sps:$4 sm:$0xff]  }
  0xdc   : > { %3169 = vmatmul.mubr.msk.bf16.vlgmr.msra.gmra.mxu1 %vm1593_vm0, %v4420_v19  ;;  %1684 = vmatpush1.bf16.msra.mxu0 %v3578_v20  ;;  %v4430_v20 = vpack.c.bf16 %v385_v15, %v385_v15  ;;  %v3751_v15 = vld [vmem:[#allocation5 + $0x54c] ss:$16 sps:$4 sm:$0xff]  }
  0xdd   : > { %1762 = vmatpush1.bf16.msra.mxu1 %v3575_v18  ;;  %1685 = vmatprep.subr.bf16.mxu0 %v3586_v22  ;;  %v3659_v18 = vld [vmem:[#allocation5 + $0x128] ss:$16 sps:$4 sm:$0xff]   ;;  %v3667_v22 = vld [vmem:[#allocation5 + $0x10c] ss:$16 sps:$4 sm:$0xff]  }
  0xde   : > { %1763 = vmatprep.subr.bf16.mxu1 %v3583_v21  ;;  %1793 = vmatprep.mubr.bf16.mxu1 %v4403_v49  ;;  %v3617_v49 = vld [vmem:[#allocation5 + $0x8] ss:$16 sps:$4 sm:$0xff]  }
  0xdf   : > { %v3662_v21 = vld [vmem:[#allocation5 + $0x2e8] ss:$16 sps:$4 sm:$0xff]  }
  0xe0   : > { %1686 = vmatpush1.bf16.msra.mxu0 %v3584_v24  ;;  %v3665_v24 = vld [vmem:[#allocation5 + $0x108] ss:$16 sps:$4 sm:$0xff]  }
  0xe1   : > { %1764 = vmatpush1.bf16.msra.mxu1 %v3581_v23  ;;  %1687 = vmatprep.subr.bf16.mxu0 %v3592_v26  ;;  %v3670_v23 = vld [vmem:[#allocation5 + $0x2cc] ss:$16 sps:$4 sm:$0xff]  }
  0xe2   : > { %1765 = vmatprep.subr.bf16.mxu1 %v3589_v25  ;;  %v3668_v25 = vld [vmem:[#allocation5 + $0x2c8] ss:$16 sps:$4 sm:$0xff]   ;;  %v3673_v26 = vld [vmem:[#allocation5 + $0x4ec] ss:$16 sps:$4 sm:$0xff]  }
  0xe4   : > { %1688 = vmatpush1.bf16.msra.mxu0 %v3590_v28  ;;  %v3671_v28 = vld [vmem:[#allocation5 + $0x4e8] ss:$16 sps:$4 sm:$0xff]  }
  0xe5   : > { %1766 = vmatpush1.bf16.msra.mxu1 %v3587_v27  ;;  %1689 = vmatprep.subr.bf16.mxu0 %v3598_v30  ;;  %v3676_v27 = vld [vmem:[#allocation5 + $0x2ac] ss:$16 sps:$4 sm:$0xff]  }
  0xe6   : > { %1767 = vmatprep.subr.bf16.mxu1 %v3595_v29  ;;  %v3674_v29 = vld [vmem:[#allocation5 + $0x2a8] ss:$16 sps:$4 sm:$0xff]   ;;  %v3679_v30 = vld [vmem:[#allocation5 + $0x4cc] ss:$16 sps:$4 sm:$0xff]  }
  0xe8   : > { %1690 = vmatpush1.bf16.msra.mxu0 %v3596_v32  ;;  %v3677_v32 = vld [vmem:[#allocation5 + $0x4c8] ss:$16 sps:$4 sm:$0xff]  }
  0xe9   : > { %1768 = vmatpush1.bf16.msra.mxu1 %v3593_v31  ;;  %1691 = vmatprep.subr.bf16.mxu0 %v3604_v34  ;;  %v3682_v31 = vld [vmem:[#allocation5 + $0x28c] ss:$16 sps:$4 sm:$0xff]  }
  0xea   : > { %1769 = vmatprep.subr.bf16.mxu1 %v3601_v33  ;;  %v3680_v33 = vld [vmem:[#allocation5 + $0x288] ss:$16 sps:$4 sm:$0xff]   ;;  %v3685_v34 = vld [vmem:[#allocation5 + $0x4ac] ss:$16 sps:$4 sm:$0xff]  }
  0xec   : > { %1692 = vmatpush1.bf16.msra.mxu0 %v3602_v38  ;;  %v3691_v38 = vld [vmem:[#allocation5 + $0x48c] ss:$16 sps:$4 sm:$0xff]  }
  0xed   : > { %1770 = vmatpush1.bf16.msra.mxu1 %v3599_v37  ;;  %1693 = vmatprep.subr.bf16.mxu0 %v3610_v40  ;;  %v3683_v37 = vld [vmem:[#allocation5 + $0x4a8] ss:$16 sps:$4 sm:$0xff]  }
  0xee   : > { %1771 = vmatprep.subr.bf16.mxu1 %v3607_v39  ;;  %v3694_v39 = vld [vmem:[#allocation5 + $0x24c] ss:$16 sps:$4 sm:$0xff]   ;;  %v3689_v40 = vld [vmem:[#allocation5 + $0x488] ss:$16 sps:$4 sm:$0xff]  }
  0xf0   : > { %1694 = vmatpush1.bf16.msra.mxu0 %v3608_v42  ;;  %v3700_v42 = vld [vmem:[#allocation5 + $0x22c] ss:$16 sps:$4 sm:$0xff]  }
  0xf1   : > { %1772 = vmatpush1.bf16.msra.mxu1 %v3605_v41  ;;  %1695 = vmatprep.subr.bf16.mxu0 %v3616_v44  ;;  %v3697_v41 = vld [vmem:[#allocation5 + $0x46c] ss:$16 sps:$4 sm:$0xff]   ;;  %v3698_v44 = vld [vmem:[#allocation5 + $0x228] ss:$16 sps:$4 sm:$0xff]  }
  0xf2   : > { %1773 = vmatprep.subr.bf16.mxu1 %v3613_v43  ;;  %v3695_v43 = vld [vmem:[#allocation5 + $0x468] ss:$16 sps:$4 sm:$0xff]  }
  0xf4   : > { %1696 = vmatpush2.bf16.msra.mxu0 %v3614_v46  ;;  %v3701_v46 = vld [vmem:[#allocation5 + $0x448] ss:$16 sps:$4 sm:$0xff]  }
  0xf5   : > { %1774 = vmatpush1.bf16.msra.mxu1 %v3611_v45  ;;  %1697 = vmatprep.subr.bf16.mxu0 %v3622_v48  ;;  %v3706_v45 = vld [vmem:[#allocation5 + $0x20c] ss:$16 sps:$4 sm:$0xff]  }
  0xf6   : > { %1775 = vmatprep.subr.bf16.mxu1 %v3619_v47  ;;  %v3704_v47 = vld [vmem:[#allocation5 + $0x208] ss:$16 sps:$4 sm:$0xff]   ;;  %v3709_v48 = vld [vmem:[#allocation5 + $0x42c] ss:$16 sps:$4 sm:$0xff]  }
  0xf8   : > { %1698 = vmatpush2.bf16.msra.mxu0 %v3620_v50  ;;  %v3707_v50 = vld [vmem:[#allocation5 + $0x428] ss:$16 sps:$4 sm:$0xff]  }
  0xf9   : > { %1776 = vmatpush1.bf16.msra.mxu1 %v3617_v49  ;;  %1699 = vmatprep.subr.bf16.mxu0 %v3628_v53  ;;  %v3712_v49 = vld [vmem:[#allocation5 + $0x3ec] ss:$16 sps:$4 sm:$0xff]  }
  0xfa   : > { %1777 = vmatprep.subr.bf16.mxu1 %v3625_v51  ;;  %v3710_v51 = vld [vmem:[#allocation5 + $0x3e8] ss:$16 sps:$4 sm:$0xff]   ;;  %v3715_v53 = vld [vmem:[#allocation5 + $0x40c] ss:$16 sps:$4 sm:$0xff]  }
  0xfc   : > { %1700 = vmatpush2.bf16.msra.mxu0 %v3626_v55  ;;  %v3713_v55 = vld [vmem:[#allocation5 + $0x408] ss:$16 sps:$4 sm:$0xff]  }
  0xfd   : > { %1778 = vmatpush2.bf16.msra.mxu1 %v3623_v54  ;;  %1701 = vmatprep.subr.bf16.mxu0 %v3634_v57  ;;  %v3718_v54 = vld [vmem:[#allocation5 + $0x3cc] ss:$16 sps:$4 sm:$0xff]  }
  0xfe   : > { %1779 = vmatprep.subr.bf16.mxu1 %v3631_v56  ;;  %v3716_v56 = vld [vmem:[#allocation5 + $0x3c8] ss:$16 sps:$4 sm:$0xff]   ;;  %v3721_v57 = vld [vmem:[#allocation5 + $0x5ec] ss:$16 sps:$4 sm:$0xff]  }
 0x100   : > { %1702 = vmatpush2.bf16.msra.mxu0 %v3632_v59  ;;  %v3719_v59 = vld [vmem:[#allocation5 + $0x5e8] ss:$16 sps:$4 sm:$0xff]  }
 0x101   : > { %1780 = vmatpush2.bf16.msra.mxu1 %v3629_v58  ;;  %1703 = vmatprep.subr.bf16.mxu0 %v3640_v61  ;;  %v3724_v58 = vld [vmem:[#allocation5 + $0x3ac] ss:$16 sps:$4 sm:$0xff]  }
 0x102   : > { %1781 = vmatprep.subr.bf16.mxu1 %v3637_v60  ;;  %v3722_v60 = vld [vmem:[#allocation5 + $0x3a8] ss:$16 sps:$4 sm:$0xff]   ;;  %v3727_v61 = vld [vmem:[#allocation5 + $0x5cc] ss:$16 sps:$4 sm:$0xff]  }
 0x104   : > { %1704 = vmatpush2.bf16.msra.mxu0 %v3638_v63  ;;  %v3725_v63 = vld [vmem:[#allocation5 + $0x5c8] ss:$16 sps:$4 sm:$0xff]  }
 0x105   : > { %1782 = vmatpush2.bf16.msra.mxu1 %v3635_v62  ;;  %1705 = vmatprep.subr.bf16.mxu0 %v3646_v1  ;;  %v3730_v62 = vld [vmem:[#allocation5 + $0x38c] ss:$16 sps:$4 sm:$0xff]  }
 0x106   : > { %1783 = vmatprep.subr.bf16.mxu1 %v3643_v0  ;;  %v3728_v0 = vld [vmem:[#allocation5 + $0x388] ss:$16 sps:$4 sm:$0xff]   ;;  %v3733_v1 = vld [vmem:[#allocation5 + $0x5ac] ss:$16 sps:$4 sm:$0xff]  }
 0x108   : > { %1706 = vmatpush2.bf16.msra.mxu0 %v3644_v3  ;;  %v3731_v3 = vld [vmem:[#allocation5 + $0x5a8] ss:$16 sps:$4 sm:$0xff]  }
 0x109   : > { %1784 = vmatpush2.bf16.msra.mxu1 %v3641_v2  ;;  %1707 = vmatprep.subr.bf16.mxu0 %v3652_v5  ;;  %v3736_v2 = vld [vmem:[#allocation5 + $0x36c] ss:$16 sps:$4 sm:$0xff]  }
 0x10a   : > { %1785 = vmatprep.subr.bf16.mxu1 %v3649_v4  ;;  %v3734_v4 = vld [vmem:[#allocation5 + $0x368] ss:$16 sps:$4 sm:$0xff]   ;;  %v3739_v5 = vld [vmem:[#allocation5 + $0x58c] ss:$16 sps:$4 sm:$0xff]  }
 0x10c   : > { %1708 = vmatpush2.bf16.msra.mxu0 %v3650_v7  ;;  %v3737_v7 = vld [vmem:[#allocation5 + $0x588] ss:$16 sps:$4 sm:$0xff]  }
 0x10d   : > { %1786 = vmatpush2.bf16.msra.mxu1 %v3647_v6  ;;  %1709 = vmatprep.subr.bf16.mxu0 %v3658_v11  ;;  %v3742_v6 = vld [vmem:[#allocation5 + $0x34c] ss:$16 sps:$4 sm:$0xff]  }
 0x10e   : > { %1787 = vmatprep.subr.bf16.mxu1 %v3655_v10  ;;  %v3740_v10 = vld [vmem:[#allocation5 + $0x348] ss:$16 sps:$4 sm:$0xff]   ;;  %v3745_v11 = vld [vmem:[#allocation5 + $0x56c] ss:$16 sps:$4 sm:$0xff]  }
 0x110   : > { %1710 = vmatpush2.bf16.msra.mxu0 %v3656_v13  ;;  %v3743_v13 = vld [vmem:[#allocation5 + $0x568] ss:$16 sps:$4 sm:$0xff]  }
 0x111   : > { %1788 = vmatpush2.bf16.msra.mxu1 %v3653_v12  ;;  %1802 = vmatprep.subr.bf16.mxu0 %v3664_v17  ;;  %v3748_v12 = vld [vmem:[#allocation5 + $0x32c] ss:$16 sps:$4 sm:$0xff]  }
 0x112   : > { %1789 = vmatprep.subr.bf16.mxu1 %v3661_v14  ;;  %v3746_v14 = vld [vmem:[#allocation5 + $0x328] ss:$16 sps:$4 sm:$0xff]   ;;  %v3754_v17 = vld [vmem:[#allocation5 + $0x30c] ss:$16 sps:$4 sm:$0xff]  }
 0x113   : > { %1712 = vmatmul.mubr.bf16.vlgmr.msra.gmra.mxu0 %v4430_v20 }
 0x114   : > { %1803 = vmatpush1.bf16.msra.mxu0 %v3662_v21  ;;  %1834 = vmatprep.mubr.bf16.mxu0 %v4406_v52  ;;  %v3686_v52 = vld [vmem:[#allocation5 + $0x268] ss:$16 sps:$4 sm:$0xff]  }
 0x115   : > { %1790 = vmatpush2.bf16.msra.mxu1 %v3659_v18  ;;  %1804 = vmatprep.subr.bf16.mxu0 %v3670_v23  ;;  %v3749_v18 = vld [vmem:[#allocation5 + $0x548] ss:$16 sps:$4 sm:$0xff]   ;;  %v3766_v23 = vld [vmem:[#allocation7 + $0x74] ss:$8 sps:$4 sm:$0xff]  }
 0x116   : > { %1791 = vmatprep.subr.bf16.mxu1 %v3667_v22  ;;  %v3752_v21 = vld [vmem:[#allocation5 + $0x308] ss:$16 sps:$4 sm:$0xff]   ;;  %v3757_v22 = vld [vmem:[#allocation5 + $0x52c] ss:$16 sps:$4 sm:$0xff]  }
 0x118   : > { %1805 = vmatpush1.bf16.msra.mxu0 %v3668_v25  ;;  %v3764_v25 = vld [vmem:[#allocation7 + $0x70] ss:$8 sps:$4 sm:$0xff]  }
 0x119   : > { %1792 = vmatpush2.bf16.msra.mxu1 %v3665_v24  ;;  %1806 = vmatprep.subr.bf16.mxu0 %v3676_v27  ;;  %v3755_v24 = vld [vmem:[#allocation5 + $0x528] ss:$16 sps:$4 sm:$0xff]   ;;  %v3769_v27 = vld [vmem:[#allocation7 + $0x64] ss:$8 sps:$4 sm:$0xff]  }
 0x11a   : > { %1843 = vmatprep.subr.bf16.mxu1 %v3673_v26  ;;  %v3760_v26 = vld [vmem:[#allocation5 + $0x50c] ss:$16 sps:$4 sm:$0xff]  }
 0x11c   : > { %1794 = vmatmul.mubr.bf16.vlgmr.msra.gmra.mxu1 %v4412_v8  ;;  %1807 = vmatpush1.bf16.msra.mxu0 %v3674_v29  ;;  %v3692_v8 = vld [vmem:[#allocation5 + $0x248] ss:$16 sps:$4 sm:$0xff]  }
 0x11d   : > { %1844 = vmatpush1.bf16.msra.mxu1 %v3671_v28  ;;  %1808 = vmatprep.subr.bf16.mxu0 %v3682_v31  ;;  %v3758_v28 = vld [vmem:[#allocation5 + $0x508] ss:$16 sps:$4 sm:$0xff]   ;;  %v3772_v31 = vld [vmem:[#allocation7 + $0x54] ss:$8 sps:$4 sm:$0xff]  }
 0x11e   : > { %1845 = vmatprep.subr.bf16.mxu1 %v3679_v30  ;;  %1875 = vmatprep.mubr.bf16.mxu1 %v4426_v36  ;;  %v3703_v36 = vld [vmem:[#allocation5 + $0x44c] ss:$16 sps:$4 sm:$0xff]   ;;  %v3767_v29 = vld [vmem:[#allocation7 + $0x60] ss:$8 sps:$4 sm:$0xff]  }
 0x11f   : > { %v3763_v30 = vld [vmem:[#allocation5 + $0x60c] ss:$16 sps:$4 sm:$0xff]  }
 0x120   : > { %1809 = vmatpush1.bf16.msra.mxu0 %v3680_v33  ;;  %v3770_v33 = vld [vmem:[#allocation7 + $0x50] ss:$8 sps:$4 sm:$0xff]  }
 0x121   : > { %1846 = vmatpush1.bf16.msra.mxu1 %v3677_v32  ;;  %1810 = vmatprep.subr.bf16.mxu0 %v3688_v35  ;;  %v3761_v32 = vld [vmem:[#allocation5 + $0x608] ss:$16 sps:$4 sm:$0xff]   ;;  %v3778_v35 = vld [vmem:[#allocation7 + $0x34] ss:$8 sps:$4 sm:$0xff]  }
 0x122   : > { %1847 = vmatprep.subr.bf16.mxu1 %v3685_v34  ;;  %v3775_v34 = vld [vmem:[#allocation7 + $0x44] ss:$8 sps:$4 sm:$0xff]  }
 0x124   : > { %1811 = vmatpush1.bf16.msra.mxu0 %v3686_v52  ;;  %v3812_v52 = vld [vmem:[#allocation7 + $0x170] ss:$8 sps:$4 sm:$0xff]  }
 0x125   : > { %1848 = vmatpush1.bf16.msra.mxu1 %v3683_v37  ;;  %1812 = vmatprep.subr.bf16.mxu0 %v3694_v39  ;;  %v3776_v37 = vld [vmem:[#allocation7 + $0x30] ss:$8 sps:$4 sm:$0xff]   ;;  %v3781_v39 = vld [vmem:[#allocation7 + $0x24] ss:$8 sps:$4 sm:$0xff]  }
 0x126   : > { %1849 = vmatprep.subr.bf16.mxu1 %v3691_v38  ;;  %v3814_v38 = vld [vmem:[#allocation7 + $0x174] ss:$8 sps:$4 sm:$0xff]  }
 0x128   : > { %1813 = vmatpush1.bf16.msra.mxu0 %v3692_v8  ;;  %v3779_v8 = vld [vmem:[#allocation7 + $0x20] ss:$8 sps:$4 sm:$0xff]  }
 0x129   : > { %1850 = vmatpush1.bf16.msra.mxu1 %v3689_v40  ;;  %1814 = vmatprep.subr.bf16.mxu0 %v3700_v42  ;;  %v3817_v40 = vld [vmem:[#allocation7 + $0x164] ss:$8 sps:$4 sm:$0xff]   ;;  %v3818_v42 = vld [vmem:[#allocation7 + $0x150] ss:$8 sps:$4 sm:$0xff]  }
 0x12a   : > { %1851 = vmatprep.subr.bf16.mxu1 %v3697_v41  ;;  %v3784_v41 = vld [vmem:[#allocation7 + $0x14] ss:$8 sps:$4 sm:$0xff]  }
 0x12c   : > { %1815 = vmatpush1.bf16.msra.mxu0 %v3698_v44  ;;  %v3823_v44 = vld [vmem:[#allocation7 + $0x144] ss:$8 sps:$4 sm:$0xff]  }
 0x12d   : > { %1852 = vmatpush1.bf16.msra.mxu1 %v3695_v43  ;;  %1816 = vmatprep.subr.bf16.mxu0 %v3706_v45  ;;  %v3782_v43 = vld [vmem:[#allocation7 + $0x10] ss:$8 sps:$4 sm:$0xff]   ;;  %v3821_v45 = vld [vmem:[#allocation7 + $0x140] ss:$8 sps:$4 sm:$0xff]  }
 0x12e   : > { %1853 = vmatprep.subr.bf16.mxu1 %v3703_v36  ;;  %v3787_v36 = vld [vmem:[#allocation7 + $0x4] ss:$8 sps:$4 sm:$0xff]  }
 0x130   : > { %1817 = vmatpush1.bf16.msra.mxu0 %v3704_v47  ;;  %v3790_v47 = vld [vmem:[#allocation7 + $0xf4] ss:$8 sps:$4 sm:$0xff]  }
 0x131   : > { %1854 = vmatpush1.bf16.msra.mxu1 %v3701_v46  ;;  %1818 = vmatprep.subr.bf16.mxu0 %v3712_v49  ;;  %v3826_v46 = vld [vmem:[#allocation7 + $0x134] ss:$8 sps:$4 sm:$0xff]   ;;  %v3788_v49 = vld [vmem:[#allocation7 + $0xf0] ss:$8 sps:$4 sm:$0xff]  }
 0x132   : > { %1855 = vmatprep.subr.bf16.mxu1 %v3709_v48  ;;  %v3824_v48 = vld [vmem:[#allocation7 + $0x130] ss:$8 sps:$4 sm:$0xff]  }
 0x134   : > { %1819 = vmatpush2.bf16.msra.mxu0 %v3710_v51  ;;  %v3793_v51 = vld [vmem:[#allocation7 + $0xe4] ss:$8 sps:$4 sm:$0xff]  }
 0x135   : > { %1856 = vmatpush1.bf16.msra.mxu1 %v3707_v50  ;;  %1820 = vmatprep.subr.bf16.mxu0 %v3718_v54  ;;  %v3829_v50 = vld [vmem:[#allocation7 + $0x124] ss:$8 sps:$4 sm:$0xff]   ;;  %v3791_v54 = vld [vmem:[#allocation7 + $0xe0] ss:$8 sps:$4 sm:$0xff]  }
 0x136   : > { %1857 = vmatprep.subr.bf16.mxu1 %v3715_v53  ;;  %v3827_v53 = vld [vmem:[#allocation7 + $0x120] ss:$8 sps:$4 sm:$0xff]  }
 0x138   : > { %1821 = vmatpush2.bf16.msra.mxu0 %v3716_v56  ;;  %v3796_v56 = vld [vmem:[#allocation7 + $0xd4] ss:$8 sps:$4 sm:$0xff]  }
 0x139   : > { %1858 = vmatpush1.bf16.msra.mxu1 %v3713_v55  ;;  %1822 = vmatprep.subr.bf16.mxu0 %v3724_v58  ;;  %v3832_v55 = vld [vmem:[#allocation7 + $0x114] ss:$8 sps:$4 sm:$0xff]   ;;  %v3794_v58 = vld [vmem:[#allocation7 + $0xd0] ss:$8 sps:$4 sm:$0xff]  }
 0x13a   : > { %1859 = vmatprep.subr.bf16.mxu1 %v3721_v57  ;;  %v3830_v57 = vld [vmem:[#allocation7 + $0x110] ss:$8 sps:$4 sm:$0xff]  }
 0x13c   : > { %1823 = vmatpush2.bf16.msra.mxu0 %v3722_v60  ;;  %v3799_v60 = vld [vmem:[#allocation7 + $0xc4] ss:$8 sps:$4 sm:$0xff]  }
 0x13d   : > { %1860 = vmatpush2.bf16.msra.mxu1 %v3719_v59  ;;  %1824 = vmatprep.subr.bf16.mxu0 %v3730_v62  ;;  %v3835_v59 = vld [vmem:[#allocation7 + $0x104] ss:$8 sps:$4 sm:$0xff]   ;;  %v3797_v62 = vld [vmem:[#allocation7 + $0xc0] ss:$8 sps:$4 sm:$0xff]  }
 0x13e   : > { %1861 = vmatprep.subr.bf16.mxu1 %v3727_v61  ;;  %v3833_v61 = vld [vmem:[#allocation7 + $0x100] ss:$8 sps:$4 sm:$0xff]  }
 0x140   : > { %1825 = vmatpush2.bf16.msra.mxu0 %v3728_v0  ;;  %v3802_v0 = vld [vmem:[#allocation7 + $0xb4] ss:$8 sps:$4 sm:$0xff]  }
 0x141   : > { %1862 = vmatpush2.bf16.msra.mxu1 %v3725_v63  ;;  %1826 = vmatprep.subr.bf16.mxu0 %v3736_v2  ;;  %v3838_v63 = vld [vmem:[#allocation7 + $0x1f4] ss:$8 sps:$4 sm:$0xff]   ;;  %v3800_v2 = vld [vmem:[#allocation7 + $0xb0] ss:$8 sps:$4 sm:$0xff]  }
 0x142   : > { %1863 = vmatprep.subr.bf16.mxu1 %v3733_v1  ;;  %v3836_v1 = vld [vmem:[#allocation7 + $0x1f0] ss:$8 sps:$4 sm:$0xff]  }
 0x144   : > { %1827 = vmatpush2.bf16.msra.mxu0 %v3734_v4  ;;  %v3805_v4 = vld [vmem:[#allocation7 + $0xa4] ss:$8 sps:$4 sm:$0xff]  }
 0x145   : > { %1864 = vmatpush2.bf16.msra.mxu1 %v3731_v3  ;;  %1828 = vmatprep.subr.bf16.mxu0 %v3742_v6  ;;  %v3841_v3 = vld [vmem:[#allocation7 + $0x1e4] ss:$8 sps:$4 sm:$0xff]   ;;  %v3803_v6 = vld [vmem:[#allocation7 + $0xa0] ss:$8 sps:$4 sm:$0xff]  }
 0x146   : > { %1865 = vmatprep.subr.bf16.mxu1 %v3739_v5  ;;  %v3839_v5 = vld [vmem:[#allocation7 + $0x1e0] ss:$8 sps:$4 sm:$0xff]  }
 0x148   : > { %1829 = vmatpush2.bf16.msra.mxu0 %v3740_v10  ;;  %v3806_v10 = vld [vmem:[#allocation7 + $0x90] ss:$8 sps:$4 sm:$0xff]  }
 0x149   : > { %1866 = vmatpush2.bf16.msra.mxu1 %v3737_v7  ;;  %1830 = vmatprep.subr.bf16.mxu0 %v3748_v12  ;;  %v3808_v7 = vld [vmem:[#allocation7 + $0x94] ss:$8 sps:$4 sm:$0xff]   ;;  %v3809_v12 = vld [vmem:[#allocation7 + $0x80] ss:$8 sps:$4 sm:$0xff]  }
 0x14a   : > { %1867 = vmatprep.subr.bf16.mxu1 %v3745_v11  ;;  %v3811_v11 = vld [vmem:[#allocation7 + $0x84] ss:$8 sps:$4 sm:$0xff]  }
 0x14c   : > { %1831 = vmatpush2.bf16.msra.mxu0 %v3746_v14 }
 0x14d   : > { %1868 = vmatpush2.bf16.msra.mxu1 %v3743_v13  ;;  %1832 = vmatprep.subr.bf16.mxu0 %v3754_v17  ;;  %v3842_v17 = vld [vmem:[#allocation7 + $0x1d0] ss:$8 sps:$4 sm:$0xff]  }
 0x14e   : > { %1869 = vmatprep.subr.bf16.mxu1 %v3751_v15  ;;  %v3844_v15 = vld [vmem:[#allocation7 + $0x1d4] ss:$8 sps:$4 sm:$0xff]  }
 0x150   : > { %1833 = vmatpush2.bf16.msra.mxu0 %v3752_v21 }
 0x151   : > { %1870 = vmatpush2.bf16.msra.mxu1 %v3749_v18  ;;  %2330 = vmatprep.subr.bf16.mxu0 %v3766_v23  ;;  %v3847_v23 = vld [vmem:[#allocation7 + $0x1c4] ss:$8 sps:$4 sm:$0xff]  }
 0x152   : > { %1871 = vmatprep.subr.bf16.mxu1 %v3757_v22  ;;  %v3845_v22 = vld [vmem:[#allocation7 + $0x1c0] ss:$8 sps:$4 sm:$0xff]  }
 0x153   : > { %1835 = vmatmul.mubr.bf16.vlgmr.msra.gmra.mxu0 %v4414_v9  ;;  %v3773_v9 = vld [vmem:[#allocation7 + $0x40] ss:$8 sps:$4 sm:$0xff]  }
 0x154   : > { %2331 = vmatpush1.bf16.msra.mxu0 %v3764_v25 }
 0x155   : > { %1872 = vmatpush2.bf16.msra.mxu1 %v3755_v24  ;;  %2332 = vmatprep.subr.bf16.mxu0 %v3769_v27 }
 0x156   : > { %1873 = vmatprep.subr.bf16.mxu1 %v3760_v26 }
 0x158   : > { %2333 = vmatpush1.bf16.msra.mxu0 %v3767_v29  ;;  %v3850_v29 = vld [vmem:[#allocation7 + $0x1b4] ss:$8 sps:$4 sm:$0xff]  }
 0x159   : > { %1874 = vmatpush2.bf16.msra.mxu1 %v3758_v28  ;;  %2334 = vmatprep.subr.bf16.mxu0 %v3772_v31 }
 0x15a   : > { %1898 = vmatprep.subr.bf16.mxu1 %v3763_v30  ;;  %v3848_v30 = vld [vmem:[#allocation7 + $0x1b0] ss:$8 sps:$4 sm:$0xff]  }
 0x15c   : > { %1876 = vmatmul.mubr.bf16.vlgmr.msra.gmra.mxu1 %v4430_v20  ;;  %2335 = vmatpush1.bf16.msra.mxu0 %v3770_v33  ;;  %v3815_v20 = vld [vmem:[#allocation7 + $0x160] ss:$8 sps:$4 sm:$0xff]   ;;  %v3853_v33 = vld [vmem:[#allocation7 + $0x1a4] ss:$8 sps:$4 sm:$0xff]  }
 0x15d   : > { %1899 = vmatpush1.bf16.msra.mxu1 %v3761_v32  ;;  %1916 = vmatprep.mubr.bf16.mxu1 %v4171_v16  ;;  %v3820_v16 = vld [vmem:[#allocation7 + $0x154] ss:$8 sps:$4 sm:$0xff]  }
 0x15e   : > { %2336 = vmatprep.subr.bf16.mxu0 %v3775_v34  ;;  %2371 = vmatprep.subr.bf16.mxu1 %v3814_v38  ;;  %v3851_v34 = vld [vmem:[#allocation7 + $0x1a0] ss:$8 sps:$4 sm:$0xff]  }
 0x15f   : > { %v3857_v38 = vld [vmem:[#allocation7 + $0x180] ss:$8 sps:$4 sm:$0xff]  }
 0x160   : > { %2337 = vmatpush1.bf16.msra.mxu0 %v3773_v9 }
 0x161   : > { %2338 = vmatprep.subr.bf16.mxu0 %v3778_v35  ;;  %v3856_v35 = vld [vmem:[#allocation7 + $0x194] ss:$8 sps:$4 sm:$0xff]  }
 0x164   : > { %3170 = vmatmul.mubr.msk.bf16.vlgmr.msra.gmra.mxu1 %vm1593_vm0, %v4420_v19  ;;  %2339 = vmatpush1.bf16.msra.mxu0 %v3776_v37  ;;  %v3785_v19 = vld [vmem:[#allocation7] ss:$8 sps:$4 sm:$0xff]   ;;  %v3854_v37 = vld [vmem:[#allocation7 + $0x190] ss:$8 sps:$4 sm:$0xff]  }
 0x165   : > { %2372 = vmatpush1.bf16.msra.mxu1 %v3812_v52  ;;  %2340 = vmatprep.subr.bf16.mxu0 %v3781_v39  ;;  %v3859_v52 = vld [vmem:[#allocation7 + $0x184] ss:$8 sps:$4 sm:$0xff]   ;;  %v593_v39 = vlaneseq }
 0x166   : > { %2373 = vmatprep.subr.bf16.mxu1 %v3817_v40 }
 0x167   : > { %v4442_v40 = vshrl.u32 %v593_v39, 7 }
 0x168   : > { %2341 = vmatpush1.bf16.msra.mxu0 %v3779_v8  ;;  %v395_v8 = vld [vmem:[#allocation13] ss:$8 sm:$0xf] }
 0x169   : > { %2374 = vmatpush1.bf16.msra.mxu1 %v3815_v20  ;;  %2342 = vmatprep.subr.bf16.mxu0 %v3784_v41  ;;  %v595_v20 = vsub.s32 0, %v4442_v40 }
 0x16a   : > { %2375 = vmatprep.subr.bf16.mxu1 %v3820_v16  ;;  %v599_v16 = vsub.s32 1, %v4442_v40 }
 0x16b   : > { %v596_v41 = vrot.slane %v395_v8, %v595_v20 }
 0x16c   : > { %2343 = vmatpush1.bf16.msra.mxu0 %v3782_v43 }
 0x16d   : > { %2376 = vmatpush1.bf16.msra.mxu1 %v3818_v42  ;;  %2344 = vmatprep.subr.bf16.mxu0 %v3787_v36  ;;  %v600_v42 = vrot.slane %v395_v8, %v599_v16 }
 0x16e   : > { %2377 = vmatprep.subr.bf16.mxu1 %v3823_v44 }
 0x170   : > { %2345 = vmatpush1.bf16.msra.mxu0 %v3785_v19 }
 0x171   : > { %2378 = vmatpush1.bf16.msra.mxu1 %v3821_v45  ;;  %2346 = vmatprep.subr.bf16.mxu0 %v3790_v47 }
 0x172   : > { %2379 = vmatprep.subr.bf16.mxu1 %v3826_v46 }
 0x174   : > { %2347 = vmatpush2.bf16.msra.mxu0 %v3788_v49 }
 0x175   : > { %2380 = vmatpush1.bf16.msra.mxu1 %v3824_v48  ;;  %2348 = vmatprep.subr.bf16.mxu0 %v3793_v51 }
 0x176   : > { %2381 = vmatprep.subr.bf16.mxu1 %v3829_v50 }
 0x178   : > { %2349 = vmatpush2.bf16.msra.mxu0 %v3791_v54 }
 0x179   : > { %2382 = vmatpush1.bf16.msra.mxu1 %v3827_v53  ;;  %2350 = vmatprep.subr.bf16.mxu0 %v3796_v56 }
 0x17a   : > { %2383 = vmatprep.subr.bf16.mxu1 %v3832_v55 }
 0x17c   : > { %2351 = vmatpush2.bf16.msra.mxu0 %v3794_v58 }
 0x17d   : > { %2384 = vmatpush1.bf16.msra.mxu1 %v3830_v57  ;;  %2352 = vmatprep.subr.bf16.mxu0 %v3799_v60 }
 0x17e   : > { %2385 = vmatprep.subr.bf16.mxu1 %v3835_v59 }
 0x180   : > { %2353 = vmatpush2.bf16.msra.mxu0 %v3797_v62 }
 0x181   : > { %2386 = vmatpush1.bf16.msra.mxu1 %v3833_v61  ;;  %2354 = vmatprep.subr.bf16.mxu0 %v3802_v0  ;;  %v603_v0 = vsub.s32 2, %v4442_v40 }
 0x182   : > { %2387 = vmatprep.subr.bf16.mxu1 %v3838_v63 }
 0x184   : > { %2355 = vmatpush2.bf16.msra.mxu0 %v3800_v2  ;;  %v607_v2 = vsub.s32 3, %v4442_v40  ;;  %v3882_v40 = vld [vmem:[#allocation10 + $0x8] sm:$0xff]  }
 0x185   : > { %2388 = vmatpush2.bf16.msra.mxu1 %v3836_v1  ;;  %2356 = vmatprep.subr.bf16.mxu0 %v3805_v4  ;;  %v604_v4 = vrot.slane %v395_v8, %v603_v0 }
 0x186   : > { %2389 = vmatprep.subr.bf16.mxu1 %v3841_v3 }
 0x188   : > { %2357 = vmatpush2.bf16.msra.mxu0 %v3803_v6  ;;  %v608_v6 = vrot.slane %v395_v8, %v607_v2  ;;  %v3869_v8 = vld [vmem:[#allocation8 + $0x18] sm:$0xff]  }
 0x189   : > { %2390 = vmatpush2.bf16.msra.mxu1 %v3839_v5  ;;  %2358 = vmatprep.subr.bf16.mxu0 %v3808_v7 }
 0x18a   : > { %2391 = vmatprep.subr.bf16.mxu1 %v3844_v15 }
 0x18c   : > { %2359 = vmatpush2.bf16.msra.mxu0 %v3806_v10 }
 0x18d   : > { %2360 = vmatprep.subr.bf16.mxu0 %v3811_v11  ;;  %2392 = vmatpush2.bf16.msra.mxu1 %v3842_v17 }
 0x18e   : > { %2393 = vmatprep.subr.bf16.mxu1 %v3847_v23 }
 0x190   : > { %2361 = vmatpush2.bf16.msra.mxu0 %v3809_v12 }
 0x191   : > { %2394 = vmatpush2.bf16.msra.mxu1 %v3845_v22 }
 0x192   : > { %2395 = vmatprep.subr.bf16.mxu1 %v3850_v29 }
 0x193   : > { %v1631_v13 = vpop.f32.mrf.mxu0 }
 0x194   : > { %v1672_v14 = vpop.f32.mrf.mxu1  ;;  %v1632_v43 = vadd.f32 %v1631_v13, %v596_v41  ;;  %v3870_v41 = vld [vmem:[#allocation8 + $0x50] sm:$0xff]  }
 0x195   : > { %v1633_v18 = vpop.f32.mrf.mxu0  ;;  %2396 = vmatpush2.bf16.msra.mxu1 %v3848_v30 }
 0x196   : > { %v1674_v21 = vpop.f32.mrf.mxu1  ;;  %2397 = vmatprep.subr.bf16.mxu1 %v3853_v33  ;;  %v1634_v44 = vadd.f32 %v1633_v18, %v600_v42  ;;  %v1673_v36 = vadd.f32 %v1672_v14, %v1632_v43  ;;  %v3864_v33 = vld [vmem:[#allocation8 + $0x68] sm:$0xff]   ;;  %v3871_v42 = vld [vmem:[#allocation8 + $0x10] sm:$0xff]  }
 0x197   : > { %v1635_v25 = vpop.f32.mrf.mxu0  ;;  %v3872_v43 = vld [vmem:[#allocation8 + $0x48] sm:$0xff]  }
 0x198   : > { %v1676_v24 = vpop.f32.mrf.mxu1  ;;  %v1675_v19 = vadd.f32 %v1674_v21, %v1634_v44  ;;  %v3861_v25 = vld [vmem:[#allocation8 + $0x38] sm:$0xff]   ;;  %v3873_v44 = vld [vmem:[#allocation8 + $0x8] sm:$0xff]  }
 0x199   : > { %v1636_v27 = vpop.f32.mrf.mxu0  ;;  %2398 = vmatpush2.bf16.msra.mxu1 %v3851_v34  ;;  %v3860_v24 = vld [vmem:[#allocation8 + $0x78] sm:$0xff]  }
 0x19a   : > { %v1677_v26 = vpop.f32.mrf.mxu1  ;;  %2399 = vmatprep.subr.bf16.mxu1 %v3856_v35  ;;  %3271 = vmatprep.subr.bf16.mxu0 %v3860_v24  ;;  %v3865_v35 = vld [vmem:[#allocation8 + $0x28] sm:$0xff]  }
 0x19b   : > { %v3862_v26 = vld [vmem:[#allocation8 + $0x70] sm:$0xff]  }
 0x19c   : > { %v1754_v28 = vpop.f32.mrf.mxu1 }
 0x19d   : > { %2400 = vmatpush2.bf16.msra.mxu1 %v3854_v37  ;;  %v3866_v37 = vld [vmem:[#allocation8 + $0x60] sm:$0xff]  }
 0x19e   : > { %v1756_v31 = vpop.f32.mrf.mxu1  ;;  %2401 = vmatprep.subr.bf16.mxu1 %v3859_v52  ;;  %v3867_v52 = vld [vmem:[#allocation8 + $0x20] sm:$0xff]  }
 0x1a0   : > { %v1758_v32 = vpop.f32.mrf.mxu1 }
 0x1a1   : > { %2402 = vmatpush2.bf16.msra.mxu1 %v3857_v38  ;;  %v3868_v38 = vld [vmem:[#allocation8 + $0x58] sm:$0xff]  }
 0x1a2   : > { %v1759_v9 = vpop.f32.mrf.mxu1 }
 0x1d3   : > { %v1713_v45 = vpop.f32.mrf.mxu0 }
 0x1d4   : > { %v1714_v46 = vadd.f32 %v1713_v45, %v1673_v36  ;;  %v3874_v36 = vld [vmem:[#allocation8 + $0x40] sm:$0xff]  }
 0x1d5   : > { %v1715_v47 = vpop.f32.mrf.mxu0  ;;  %v3875_v45 = vld [vmem:[#allocation8] sm:$0xff]  }
 0x1d6   : > { %v1755_v48 = vadd.f32 %v1754_v28, %v1714_v46  ;;  %v1716_v49 = vadd.f32 %v1715_v47, %v1675_v19  ;;  %v3876_v19 = vld [vmem:[#allocation10 + $0x38] sm:$0xff]   ;;  %v4172_v46 = vmov 0.0   ;;  %v3877_v47 = vld [vmem:[#allocation10 + $0x30] sm:$0xff]  }
 0x1d7   : > { %v1717_v50 = vpop.f32.mrf.mxu0  ;;  %3311 = vmatprep.subr.bf16.mxu1 %v4172_v46 }
 0x1d8   : > { %v1757_v51 = vadd.f32 %v1756_v31, %v1716_v49  ;;  %v1925_v53 = vmax.f32 %v1755_v48, 0.0  ;;  %v3863_v31 = vld [vmem:[#allocation8 + $0x30] sm:$0xff]   ;;  %v3878_v48 = vld [vmem:[#allocation10 + $0x28] sm:$0xff]   ;;  %v3879_v49 = vld [vmem:[#allocation10 + $0x20] sm:$0xff]  }
 0x1d9   : > { %v1718_v54 = vpop.f32.mrf.mxu0  ;;  %v3880_v50 = vld [vmem:[#allocation10 + $0x18] sm:$0xff]  }
 0x1da   : > { %v1926_v55 = vmax.f32 %v1757_v51, 0.0  ;;  %v1929_v58 = vpack.c.bf16 %v1925_v53, %v1925_v53 }
 0x1dc   : > { %v1795_v56 = vpop.f32.mrf.mxu1  ;;  %v1930_v57 = vpack.c.bf16 %v1926_v55, %v1926_v55 }
 0x1dd   : > { %v1796_v10 = vadd.f32 %v1795_v56, %v604_v4  ;;  %v1934_v56 = vld [vmem:[#allocation13 + $0x1] ss:$8 sm:$0x3] }
 0x1de   : > { %v1797_v59 = vpop.f32.mrf.mxu1  ;;  %2362 = vmatprep.mubr.bf16.mxu0 %v1930_v57  ;;  %v2003_v57 = vrot.slane %v1934_v56, %v595_v20  ;;  %v3883_v20 = vld [vmem:[#allocation10] sm:$0xff]  }
 0x1df   : > { %2363 = vmatmul.mubr.bf16.vlgmr.msra.gmra.mxu0 %v1929_v58  ;;  %v1798_v12 = vadd.f32 %v1797_v59, %v608_v6  ;;  %v2007_v58 = vrot.slane %v1934_v56, %v599_v16  ;;  %v3884_v16 = vld [vmem:[#allocation11 + $0x38] sm:$0xff]  }
 0x1e0   : > { %v1799_v60 = vpop.f32.mrf.mxu1  ;;  %3272 = vmatpush3.bf16.msra.mxu0 %v3861_v25 }
 0x1e1   : > { %3273 = vmatprep.subr.bf16.mxu0 %v3862_v26 }
 0x1e2   : > { %v1800_v61 = vpop.f32.mrf.mxu1 }
 0x1e4   : > { %3274 = vmatpush3.bf16.msra.mxu0 %v3863_v31 }
 0x1e5   : > { %3275 = vmatprep.subr.bf16.mxu0 %v3864_v33 }
 0x1e8   : > { %3276 = vmatpush3.bf16.msra.mxu0 %v3865_v35 }
 0x1e9   : > { %3277 = vmatprep.subr.bf16.mxu0 %v3866_v37  ;;  %v2800_v37 = vand.u32 127, %v593_v39 }
 0x1eb   : > { %vm2801_vm2 = vcmp.lt.s32.totalorder %v2800_v37, 10 }
 0x1ec   : > { %3278 = vmatpush3.bf16.msra.mxu0 %v3867_v52  ;;  %v2694_v52 = vld [vmem:[#allocation13 + $0x4] ss:$0 sm:$0xff] }
 0x1ed   : > { %3279 = vmatprep.subr.bf16.mxu0 %v3868_v38 }
 0x1f0   : > { %3280 = vmatpush3.bf16.msra.mxu0 %v3869_v8 }
 0x1f1   : > { %3281 = vmatprep.subr.bf16.mxu0 %v3870_v41 }
 0x1f4   : > { %3282 = vmatpush3.bf16.msra.mxu0 %v3871_v42 }
 0x1f5   : > { %3283 = vmatprep.subr.bf16.mxu0 %v3872_v43 }
 0x1f8   : > { %3284 = vmatpush3.bf16.msra.mxu0 %v3873_v44 }
 0x1f9   : > { %3285 = vmatprep.subr.bf16.mxu0 %v3874_v36 }
 0x1fc   : > { %3286 = vmatpush3.bf16.msra.mxu0 %v3875_v45 }
 0x1fd   : > { %3331 = vmatprep.subr.bf16.mxu0 %v4172_v46 }
 0x213   : > { %v1836_v62 = vpop.f32.mrf.mxu0 }
 0x214   : > { %v1837_v13 = vadd.f32 %v1836_v62, %v1796_v10  ;;  %v3885_v10 = vld [vmem:[#allocation11 + $0x30] sm:$0xff]  }
 0x215   : > { %v1838_v63 = vpop.f32.mrf.mxu0 }
 0x216   : > { %v1839_v15 = vadd.f32 %v1838_v63, %v1798_v12  ;;  %v3887_v12 = vld [vmem:[#allocation11 + $0x20] sm:$0xff]  }
 0x217   : > { %v1840_v1 = vpop.f32.mrf.mxu0 }
 0x219   : > { %v1841_v3 = vpop.f32.mrf.mxu0 }
 0x21c   : > { %v1877_v5 = vpop.f32.mrf.mxu1 }
 0x21d   : > { %v1878_v17 = vadd.f32 %v1877_v5, %v1837_v13  ;;  %v3888_v13 = vld [vmem:[#allocation11 + $0x18] sm:$0xff]  }
 0x21e   : > { %v1879_v7 = vpop.f32.mrf.mxu1 }
 0x21f   : > { %v1880_v21 = vadd.f32 %v1879_v7, %v1839_v15  ;;  %v3881_v7 = vld [vmem:[#allocation10 + $0x10] sm:$0xff]  }
 0x220   : > { %v1881_v11 = vpop.f32.mrf.mxu1 }
 0x221   : > { %v3886_v11 = vld [vmem:[#allocation11 + $0x28] sm:$0xff]  }
 0x222   : > { %v1882_v14 = vpop.f32.mrf.mxu1 }
 0x223   : > { %v3889_v14 = vld [vmem:[#allocation11 + $0x10] sm:$0xff]  }
 0x224   : > { %v1918_v18 = vpop.f32.mrf.mxu1 }
 0x225   : > { %v1919_v22 = vadd.f32 %v1918_v18, %v1878_v17  ;;  %v2416_v17 = vld [vmem:[#allocation13 + $0x2] ss:$0 sm:$0xff] }
 0x226   : > { %v1920_v23 = vpop.f32.mrf.mxu1 }
 0x227   : > { %v1921_v27 = vadd.f32 %v1920_v23, %v1880_v21  ;;  %v1927_v28 = vmax.f32 %v1919_v22, 0.0 }
 0x228   : > { %v1922_v29 = vpop.f32.mrf.mxu1 }
 0x229   : > { %v1928_v30 = vmax.f32 %v1921_v27, 0.0  ;;  %v1931_v9 = vpack.c.bf16 %v1927_v28, %v1927_v28  ;;  %v3890_v27 = vld [vmem:[#allocation11 + $0x8] sm:$0xff]   ;;  %v3891_v28 = vld [vmem:[#allocation11] sm:$0xff]  }
 0x22a   : > { %v1923_v32 = vpop.f32.mrf.mxu1  ;;  %v2587_v29 = vld [vmem:[#allocation13 + $0x3] ss:$0 sm:$0xff] }
 0x22b   : > { %v1932_v34 = vpack.c.bf16 %v1928_v30, %v1928_v30 }
 0x22d   : > { %2403 = vmatprep.mubr.bf16.mxu1 %v1932_v34 }
 0x22e   : > { %2404 = vmatmul.mubr.bf16.vlgmr.msra.gmra.mxu1 %v1931_v9 }
 0x22f   : > { %3312 = vmatpush3.bf16.msra.mxu1 %v3876_v19  ;;  %3327 = vmatprep.mubr.msk.bf16.mxu1 %vm4173_vm1, %v4172_v46 }
 0x230   : > { %3313 = vmatprep.subr.bf16.mxu1 %v4172_v46 }
 0x233   : > { %3314 = vmatpush3.bf16.msra.mxu1 %v3877_v47 }
 0x234   : > { %3315 = vmatprep.subr.bf16.mxu1 %v4172_v46 }
 0x237   : > { %3316 = vmatpush3.bf16.msra.mxu1 %v3878_v48 }
 0x238   : > { %3317 = vmatprep.subr.bf16.mxu1 %v4172_v46 }
 0x23b   : > { %3318 = vmatpush3.bf16.msra.mxu1 %v3879_v49 }
 0x23c   : > { %3319 = vmatprep.subr.bf16.mxu1 %v4172_v46 }
 0x23f   : > { %3320 = vmatpush3.bf16.msra.mxu1 %v3880_v50 }
 0x240   : > { %3321 = vmatprep.subr.bf16.mxu1 %v4172_v46 }
 0x243   : > { %3322 = vmatpush3.bf16.msra.mxu1 %v3881_v7 }
 0x244   : > { %3323 = vmatprep.subr.bf16.mxu1 %v4172_v46 }
 0x247   : > { %3324 = vmatpush3.bf16.msra.mxu1 %v3882_v40 }
 0x248   : > { %3325 = vmatprep.subr.bf16.mxu1 %v4172_v46 }
 0x24b   : > { %3326 = vmatpush3.bf16.msra.mxu1 %v3883_v20 }
 0x29f   : > { %v2364_v51 = vpop.f32.mrf.mxu0 }
 0x2a0   : > { %v2365_v59 = vadd.f32 %v2364_v51, %v2003_v57 }
 0x2a1   : > { %v2366_v53 = vpop.f32.mrf.mxu0 }
 0x2a2   : > { %v2367_v61 = vadd.f32 %v2366_v53, %v2007_v58 }
 0x2a3   : > { %v2368_v54 = vpop.f32.mrf.mxu0 }
 0x2a5   : > { %v2369_v55 = vpop.f32.mrf.mxu0 }
 0x2ee   : > { %v2405_v60 = vpop.f32.mrf.mxu1 }
 0x2ef   : > { %v2406_v62 = vadd.f32 %v2405_v60, %v2365_v59 }
 0x2f0   : > { %v2407_v63 = vpop.f32.mrf.mxu1 }
 0x2f1   : > { %v2408_v0 = vadd.f32 %v2407_v63, %v2367_v61  ;;  %v2412_v1 = vmax.f32 %v2406_v62, 0.0 }
 0x2f2   : > { %v2409_v2 = vpop.f32.mrf.mxu1 }
 0x2f3   : > { %v2413_v3 = vmax.f32 %v2408_v0, 0.0  ;;  %v2414_v6 = vpack.c.bf16 %v2412_v1, %v2412_v1 }
 0x2f4   : > { %v2410_v4 = vpop.f32.mrf.mxu1 }
 0x2f5   : > { %v2415_v5 = vpack.c.bf16 %v2413_v3, %v2413_v3 }
 0x2f7   : > { %2577 = vmatprep.mubr.bf16.mxu0 %v2415_v5 }
 0x2f8   : > { %2578 = vmatmul.mubr.bf16.vlgmr.msra.gmra.mxu0 %v2414_v6 }
 0x2f9   : > { %3347 = vmatprep.mubr.msk.bf16.mxu0 %vm4173_vm1, %v4172_v46  ;;  %3332 = vmatpush3.bf16.msra.mxu0 %v3884_v16 }
 0x2fa   : > { %3333 = vmatprep.subr.bf16.mxu0 %v4172_v46 }
 0x2fd   : > { %3334 = vmatpush3.bf16.msra.mxu0 %v3885_v10 }
 0x2fe   : > { %3335 = vmatprep.subr.bf16.mxu0 %v4172_v46 }
 0x301   : > { %3336 = vmatpush3.bf16.msra.mxu0 %v3886_v11 }
 0x302   : > { %3337 = vmatprep.subr.bf16.mxu0 %v4172_v46 }
 0x305   : > { %3338 = vmatpush3.bf16.msra.mxu0 %v3887_v12 }
 0x306   : > { %3339 = vmatprep.subr.bf16.mxu0 %v4172_v46 }
 0x309   : > { %3340 = vmatpush3.bf16.msra.mxu0 %v3888_v13 }
 0x30a   : > { %3341 = vmatprep.subr.bf16.mxu0 %v4172_v46 }
 0x30d   : > { %3342 = vmatpush3.bf16.msra.mxu0 %v3889_v14 }
 0x30e   : > { %3343 = vmatprep.subr.bf16.mxu0 %v4172_v46 }
 0x311   : > { %3344 = vmatpush3.bf16.msra.mxu0 %v3890_v27 }
 0x312   : > { %3345 = vmatprep.subr.bf16.mxu0 %v4172_v46 }
 0x315   : > { %3346 = vmatpush3.bf16.msra.mxu0 %v3891_v28 }
 0x3b8   : > { %v3287_v15 = vpop.f32.mrf.mxu0 }
 0x3ba   : > { %v3288_v18 = vpop.f32.mrf.mxu0 }
 0x3bb   : > { %v3289_v21 = vadd.f32 %v3288_v18, %v3287_v15 }
 0x3bc   : > { %v3290_v22 = vpop.f32.mrf.mxu0 }
 0x3bd   : > { %v2580_v23 = vadd.f32 %v3289_v21, %v2416_v17 }
 0x3be   : > { %v3291_v24 = vpop.f32.mrf.mxu0 }
 0x3bf   : > { %v2585_v25 = vmax.f32 %v2580_v23, 0.0 }
 0x3c1   : > { %v2586_v26 = vpack.c.bf16 %v2585_v25, %v2585_v25 }
 0x3c3   : > { %3328 = vmatmul.mubr.bf16.vlgmr.msra.gmra.mxu1 %v2586_v26 }
 0x483   : > { %v2686_v30 = vpop.f32.mrf.mxu1 }
 0x484   : > { %v2687_v31 = vadd.f32 %v2686_v30, %v2587_v29 }
 0x485   : > { %v3329_v32 = vpop.f32.mrf.mxu1 }
 0x486   : > { %v2692_v33 = vmax.f32 %v2687_v31, 0.0 }
 0x487   : > { %v2689_v34 = vpop.f32.mrf.mxu1 }
 0x488   : > { %v2693_v9 = vpack.c.bf16 %v2692_v33, %v2692_v33 }
 0x489   : > { %v3330_v35 = vpop.f32.mrf.mxu1 }
 0x48a   : > { %3348 = vmatmul.mubr.bf16.vlgmr.msra.gmra.mxu0 %v2693_v9 }
 0x54a   : > { %v2793_v38 = vpop.f32.mrf.mxu0 }
 0x54b   : > { %v2794_v8 = vadd.f32 %v2793_v38, %v2694_v52 }
 0x54c   : > { %v3349_v41 = vpop.f32.mrf.mxu0 }
 0x54d   : > { %v2802_v42 = vsel %vm2801_vm2, %v2794_v8, -1e+30 }
 0x54e   : > { %2803 = vmax.xlane.f32.xlu0 %v2802_v42  ;;  %v2796_v43 = vpop.f32.mrf.mxu0 }
 0x550   : > { %v3350_v44 = vpop.f32.mrf.mxu0 }
 0x5d7   : > { %v2804_v36 = vpop.xlane.xlu0 %2803 }
 0x5d8   : > { %v2805_v45 = vsub.f32 %v2802_v42, %v2804_v36 }
 0x5da   : > { %v2806_v19 = vmul.f32 1.442695, %v2805_v45 }
 0x5dc   : > { %3892 = vpow2.f32 %v2806_v19 }
 0x5e9   : > { %v3893_v46 = vpop.eup %3892 }
 0x5ea   : > { %2808 = vadd.xlane.f32.xlu0 %v3893_v46 }
 0x673   : > { %v2809_v39 = vpop.xlane.xlu0 %2808 }
 0x674   : > { %3894 = vlog2.f32 %v2809_v39 }
 0x681   : > { %v3895_v47 = vpop.eup %3894 }
 0x682   : > { %v2811_v48 = vmul.f32 0.6931472, %v3895_v47 }
 0x684   : > { %v2812_v49 = vsub.f32 %v2805_v45, %v2811_v48 }
 0x686   : > { %2813 = vst [vmem:[%s379_s19] sm:$0xff] %v2812_v49 }
 0x687   : > { %4093 = shalt.err (!%p4090_p1)
}
 0x688   : > { %s4094_s16 = scalar_lea.hbm %s2826_s14, 128  ;;  %s4098_s22 = scalar_lea.hbm %s4518_s7, 256 }
 0x689   : > { %p4095_p3 = scmp.ne.s32.totalorder %s2826_s14, %s4094_s16  ;;  %p4099_p12 = scmp.lt.s32.totalorder %s2826_s14, %s4518_s7 }
 0x68a   : > { %p4100_p11 = scmp.lt.s32.totalorder %s4098_s22, %s4094_s16 }
 0x68b   : > { %p4096_p5 = pnand %p4095_p3, %p4542_p6 }
 0x68c   : > { %p4101_p7 = por %p4100_p11, %p4099_p12 }
 0x68d   : > { %p4097_p10 = pneg %p4096_p5 }
 0x68f   : > { %p4102_p2 = pnand %p4101_p7, %p4097_p10 }
 0x691   : > { %4105 = shalt.err (!%p4102_p2)
}
 0x692   : > { %3380 = dma.vmem_to_hbm [thread:$0]  (%p4542_p6), %s2829_s9, 128, %s2826_s14, %s2815_s10  }
 0x693 PF: > { %s2840_s8 = sand.u32 1, %s4144_s24   ;;  %p4543_p8 = scmp.ne.s32.totalorder %s4532_s23, 0 }
 0x694   : > { %p4544_p9 = scmp.ge.s32.totalorder %s4156_s27, 2  ;;  %s2841_s19 = scalar_lea.sflag [#allocation4], %s2840_s8 }
 0x696   : > { %p3406_p4 = pnand %p4544_p9, %p4543_p8 }
 0x698   : > { %p3407_p13 = pneg %p3406_p4 }
 0x69a   : > { %4139 = dma.done.wait (%p3407_p13), %s2841_s19, 128  }
 0x69b   : > { %4141 = vsyncadd (%p3407_p13), %s2841_s19, 4294967168  ;;  %p23_p0 = scmp.ge.s32.totalorder %s4323_s11, 4   ;;  %s4545_s24 = smov %s4148_s25 }
 0x69c   : > { %s4546_s25 = smov %s4152_s26  ;;  %s4547_s26 = smov %s4334_s18 }
 0x69d   : > { %s4548_s27 = smov %s4323_s11  ;;  %25 = sbr.rel (!%p23_p0) target bundleno = 11 (0xb), region = 118 }
 0x6a2   :  { %2846 = vsyncpa [#allocation3], 1 }
 0x6a3   :  { %2848 = vsyncpa [#allocation3 + $0x1], 1 }
 0x6a4   :  { %2849 = vsyncpa [#allocation6], 1 }
 0x6a5   :  { %2850 = vsyncpa [#allocation9], 1 }
 0x6a6   :  { %2851 = vsyncpa [#allocation12], 1 }
 0x6a7   :  { %2852 = vsyncpa [#allocation4], 1 }
 0x6a8   :  { %2854 = vsyncpa [#allocation4 + $0x1], 1 }

</bundles_post_ra>
